<compile_context>
chip_gen: v7x
topology: tpu7x:2x2x1
jax: 0.10.0
libtpu: 0.0.40
codegen_flags: <defaults>
</compile_context>

<pallas_src>
import numpy as np
import jax
import jax.numpy as jnp
from jax.experimental import pallas as pl
from jax.experimental.pallas import tpu as pltpu

# ---- configuration (mirrors Decoder.__init__ args chosen above) -------------
IN_CHANNELS = 4
OUT_CHANNELS = 4
NCONVS = 2
KSIZE = 3
LANE = 128


def _round_up(a, m):
    return (a + m - 1) // m * m


# ============================ fused Pallas kernel =============================
def _build_fused_decoder_call(N, H, W, c_in, c_out, k):
    """Two conv(kxk, 'same') + ReLU stages fused into one pallas_call.

    Layout: channels on sublanes, flattened zero-halo-padded spatial on lanes.
    Per image the padded (Hp, Wp) image is flattened row-major into a lane
    block of `stride` lanes (stride = Hp*Wp rounded up to 128); all N images
    are concatenated along lanes.  Tap (kh, kw) is then the static lane shift
    d = kh*Wp + kw, so each conv is nine (c_out, c) @ (c, N*stride) MXU dots
    with f32 accumulation, all lane-dense.
    """
    p = k // 2
    Hp, Wp = H + 2 * p, W + 2 * p
    E = H * Wp                                # extended outputs per image
    stride = _round_up(Hp * Wp, LANE)         # per-image lane stride
    L = N * stride                            # total output lanes
    maxd = (k - 1) * (Wp + 1)                 # largest tap shift
    XW = _round_up(L + maxd, LANE)            # input lane width (zero tail)
    pad_off = p * Wp + p                      # flat offset of image pixel (0,0)
    BASE = _round_up(pad_off, LANE)           # 128-aligned hand-off offset
    YW = _round_up(BASE + L + (maxd - pad_off), LANE)   # scratch lane width
    taps = [(kh * Wp + kw, kh * k + kw) for kh in range(k) for kw in range(k)]

    def kernel(x_ref, mask_ref, w1_ref, b1_ref, w2_ref, b2_ref, o_ref, y_ref):
        # -------- conv 1 + ReLU: nine lane-shifted MXU dots, f32 acc ---------
        acc = None
        for d, t in taps:
            part = jnp.dot(w1_ref[t], x_ref[:, d:d + L],
                           preferred_element_type=jnp.float32)
            acc = part if acc is None else acc + part
        # NOTE(correctness): this mask is what realises conv2's zero padding —
        # it zeroes the halo columns (col >= W) and the tail lanes (e >= E) of
        # every image block before the hand-off.  Removing it breaks conv2,
        # not just the final slicing in the wrapper.
        h1 = jnp.maximum(acc + b1_ref[...], 0.0) * mask_ref[...]

        # -------- hand-off: lane-aligned store into padded scratch -----------
        y_ref[:, :BASE] = jnp.zeros((c_out, BASE), jnp.float32)
        y_ref[:, BASE + L:] = jnp.zeros((c_out, YW - BASE - L), jnp.float32)
        y_ref[:, BASE:BASE + L] = h1

        # -------- conv 2 + ReLU ----------------------------------------------
        acc2 = None
        for d, t in taps:
            off = BASE - pad_off + d
            part = jnp.dot(w2_ref[t], y_ref[:, off:off + L],
                           preferred_element_type=jnp.float32)
            acc2 = part if acc2 is None else acc2 + part
        o_ref[...] = jnp.maximum(acc2 + b2_ref[...], 0.0)

    return pl.pallas_call(
        kernel,
        out_shape=jax.ShapeDtypeStruct((c_out, L), jnp.float32),
        grid_spec=pltpu.PrefetchScalarGridSpec(
            num_scalar_prefetch=0,
            grid=(1,),                                   # whole batch in one step
            in_specs=[
                pl.BlockSpec((c_in, XW), lambda i: (0, 0)),
                pl.BlockSpec((1, L), lambda i: (0, 0)),
                pl.BlockSpec((k * k, c_out, c_in), lambda i: (0, 0, 0)),
                pl.BlockSpec((c_out, 1), lambda i: (0, 0)),
                pl.BlockSpec((k * k, c_out, c_out), lambda i: (0, 0, 0)),
                pl.BlockSpec((c_out, 1), lambda i: (0, 0)),
            ],
            out_specs=pl.BlockSpec((c_out, L), lambda i: (0, 0)),
            scratch_shapes=[pltpu.VMEM((c_out, YW), jnp.float32)],
        ),
        compiler_params=pltpu.CompilerParams(
            dimension_semantics=("arbitrary",)),
    )


# ================================ JAX glue =====================================
def _nearest_exact_idx(in_size, out_size):
    # PyTorch 'nearest-exact': src = clamp(floor((dst + 0.5) * in/out), 0, in-1)
    scale = in_size / out_size
    idx = np.floor((np.arange(out_size) + 0.5) * scale)
    return jnp.asarray(np.clip(idx, 0, in_size - 1).astype(np.int32))


def _interpolate_nearest_exact(x_nchw, out_hw):
    H_out, W_out = out_hw
    _, _, H_in, W_in = x_nchw.shape
    x = jnp.take(x_nchw, _nearest_exact_idx(H_in, H_out), axis=2)
    x = jnp.take(x, _nearest_exact_idx(W_in, W_out), axis=3)
    return x


def init_params(key):
    """Deterministic synthetic parameters.

    Returns (raw, packed):
      raw    : list of (w (k,k,cin,cout) HWIO, b (cout,))     -- for the reference
      packed : list of (w (k*k,cout,cin), b (cout,1))         -- for the kernel
    """
    raw, packed = [], []
    cin = IN_CHANNELS + OUT_CHANNELS
    for _ in range(NCONVS):
        cout = OUT_CHANNELS
        key, kw_, kb_ = jax.random.split(key, 3)
        fan_in = cin * KSIZE * KSIZE
        w = jax.random.normal(kw_, (KSIZE, KSIZE, cin, cout), jnp.float32) / jnp.sqrt(fan_in)
        b = 0.01 * jax.random.normal(kb_, (cout,), jnp.float32)
        raw.append((w, b))
        packed.append((jnp.transpose(w, (0, 1, 3, 2)).reshape(KSIZE * KSIZE, cout, cin),
                       b[:, None]))
        cin = cout
    return raw, packed


@jax.jit
def decoder_forward(packed_params, x, x_old):
    """Pallas-backed forward. x, x_old, output are NCHW (PyTorch convention)."""
    assert NCONVS == 2  # the fused kernel implements exactly two conv+ReLU stages
    (w1, b1), (w2, b2) = packed_params
    N, _, H, W = x_old.shape
    c_in = IN_CHANNELS + OUT_CHANNELS
    c_out = OUT_CHANNELS
    k, p = KSIZE, KSIZE // 2
    Hp, Wp = H + 2 * p, W + 2 * p
    E = H * Wp
    stride = _round_up(Hp * Wp, LANE)
    L = N * stride
    maxd = (k - 1) * (Wp + 1)
    XW = _round_up(L + maxd, LANE)

    # upsample + skip concat + halo pad + channels->sublanes packing (jit-fused)
    x_up = _interpolate_nearest_exact(x, (H, W))
    h = jnp.concatenate([x_old, x_up], axis=1)                 # (N, c_in, H, W)
    hp = jnp.pad(h, ((0, 0), (0, 0), (p, p), (p, p)))          # zero halo
    xf = hp.reshape(N, c_in, Hp * Wp)
    xf = jnp.pad(xf, ((0, 0), (0, 0), (0, stride - Hp * Wp)))  # per-image lane stride
    xf = jnp.transpose(xf, (1, 0, 2)).reshape(c_in, L)         # channels on sublanes
    xf = jnp.pad(xf, ((0, 0), (0, XW - L)))                    # zero tail for last taps

    # static 0/1 mask of the real (non-halo-column, non-tail) lanes; it also
    # provides conv2's zero padding inside the kernel (see kernel NOTE).
    e = np.arange(L) % stride
    mask = jnp.asarray(((e < E) & (e % Wp < W)).astype(np.float32)[None, :])

    call = _build_fused_decoder_call(N, H, W, c_in, c_out, k)
    out = call(xf, mask, w1, b1, w2, b2)                       # (c_out, L)
    out = out.reshape(c_out, N, stride)[:, :, :E]              # drop per-image tail
    out = out.reshape(c_out, N, H, Wp)[:, :, :, :W]            # drop halo columns
    return jnp.transpose(out, (1, 0, 2, 3))                    # -> NCHW


def reference_forward(raw_params, x, x_old):
    """Pure-JAX reference (lax conv) with identical semantics."""
    N, _, H, W = x_old.shape
    x_up = _interpolate_nearest_exact(x, (H, W))
    h = jnp.concatenate([x_old, x_up], axis=1)
    h = jnp.transpose(h, (0, 2, 3, 1))
    for (w, b) in raw_params:
        h = jax.lax.conv_general_dilated(
            h, w, window_strides=(1, 1), padding="SAME",
            dimension_numbers=("NHWC", "HWIO", "NHWC"))
        h = jnp.maximum(h + b, 0.0)
    return jnp.transpose(h, (0, 3, 1, 2))


# ================================== main =======================================
if __name__ == "__main__":
    key = jax.random.PRNGKey(0)
    kx, kxo, kp = jax.random.split(key, 3)

    # x: deeper decoder feature (smaller spatial), x_old: skip connection.
    x = jax.random.normal(kx, (2, IN_CHANNELS, 8, 8), jnp.float32)
    x_old = jax.random.normal(kxo, (2, OUT_CHANNELS, 16, 16), jnp.float32)

    raw_params, packed_params = init_params(kp)

    out = decoder_forward(packed_params, x, x_old)
    out = jax.block_until_ready(out)
    assert out.shape == (2, OUT_CHANNELS, 16, 16)

    ref = reference_forward(raw_params, x, x_old)
    np.testing.assert_allclose(np.asarray(out), np.asarray(ref), rtol=1e-4, atol=1e-4)

    print("KERNEL_OK")
</pallas_src>

<mosaic_0001>
module attributes {stable_mosaic.version = 11 : i64} {
  func.func @kernel(%arg0: i32, %arg1: memref<8x896xf32, #tpu.memory_space<vmem>>, %arg2: memref<1x768xf32, #tpu.memory_space<vmem>>, %arg3: memref<9x4x8xf32, #tpu.memory_space<vmem>>, %arg4: memref<4x1xf32, #tpu.memory_space<vmem>>, %arg5: memref<9x4x4xf32, #tpu.memory_space<vmem>>, %arg6: memref<4x1xf32, #tpu.memory_space<vmem>>, %arg7: memref<4x768xf32, #tpu.memory_space<vmem>>, %arg8: memref<4x1024xf32, #tpu.memory_space<vmem>>) attributes {dimension_semantics = [#tpu.dimension_semantics<arbitrary>], iteration_bounds = array<i64: 1>, scalar_prefetch = 0 : i64, scratch_operands = 1 : i64, tpu.core_type = #tpu.core_type<tc>, window_params = [{pipeline_mode = #tpu.pipeline_mode<synchronous>, transform_indices = @transform_0, window_bounds = array<i64: 8, 896>}, {pipeline_mode = #tpu.pipeline_mode<synchronous>, transform_indices = @transform_1, window_bounds = array<i64: 1, 768>}, {pipeline_mode = #tpu.pipeline_mode<synchronous>, transform_indices = @transform_2, window_bounds = array<i64: 9, 4, 8>}, {pipeline_mode = #tpu.pipeline_mode<synchronous>, transform_indices = @transform_3, window_bounds = array<i64: 4, 1>}, {pipeline_mode = #tpu.pipeline_mode<synchronous>, transform_indices = @transform_4, window_bounds = array<i64: 9, 4, 4>}, {pipeline_mode = #tpu.pipeline_mode<synchronous>, transform_indices = @transform_5, window_bounds = array<i64: 4, 1>}, {pipeline_mode = #tpu.pipeline_mode<synchronous>, transform_indices = @transform_6, window_bounds = array<i64: 4, 768>}]} {
    %c0 = arith.constant 0 : index
    %c0_0 = arith.constant 0 : index
    %c0_1 = arith.constant 0 : index
    %0 = vector.load %arg3[%c0, %c0_0, %c0_1] : memref<9x4x8xf32, #tpu.memory_space<vmem>>, vector<1x4x8xf32>
    %1 = vector.shape_cast %0 : vector<1x4x8xf32> to vector<4x8xf32>
    %c0_2 = arith.constant 0 : index
    %c0_3 = arith.constant 0 : index
    %2 = vector.load %arg1[%c0_2, %c0_3] : memref<8x896xf32, #tpu.memory_space<vmem>>, vector<8x768xf32>
    %cst = arith.constant dense<0.000000e+00> : vector<4x768xf32>
    %3 = tpu.matmul %1, %2, %cst {dimension_numbers = #tpu.dot_dimension_numbers<[1], [0], [0], [1], [0, 0, 1, 1], [], []>} : vector<4x8xf32>, vector<8x768xf32>, vector<4x768xf32> -> vector<4x768xf32>
    %c1 = arith.constant 1 : index
    %c0_4 = arith.constant 0 : index
    %c0_5 = arith.constant 0 : index
    %4 = vector.load %arg3[%c1, %c0_4, %c0_5] : memref<9x4x8xf32, #tpu.memory_space<vmem>>, vector<1x4x8xf32>
    %5 = vector.shape_cast %4 : vector<1x4x8xf32> to vector<4x8xf32>
    %c0_6 = arith.constant 0 : index
    %c1_7 = arith.constant 1 : index
    %6 = vector.load %arg1[%c0_6, %c1_7] : memref<8x896xf32, #tpu.memory_space<vmem>>, vector<8x768xf32>
    %cst_8 = arith.constant dense<0.000000e+00> : vector<4x768xf32>
    %7 = tpu.matmul %5, %6, %cst_8 {dimension_numbers = #tpu.dot_dimension_numbers<[1], [0], [0], [1], [0, 0, 1, 1], [], []>} : vector<4x8xf32>, vector<8x768xf32>, vector<4x768xf32> -> vector<4x768xf32>
    %8 = arith.addf %3, %7 : vector<4x768xf32>
    %c2 = arith.constant 2 : index
    %c0_9 = arith.constant 0 : index
    %c0_10 = arith.constant 0 : index
    %9 = vector.load %arg3[%c2, %c0_9, %c0_10] : memref<9x4x8xf32, #tpu.memory_space<vmem>>, vector<1x4x8xf32>
    %10 = vector.shape_cast %9 : vector<1x4x8xf32> to vector<4x8xf32>
    %c0_11 = arith.constant 0 : index
    %c2_12 = arith.constant 2 : index
    %11 = vector.load %arg1[%c0_11, %c2_12] : memref<8x896xf32, #tpu.memory_space<vmem>>, vector<8x768xf32>
    %cst_13 = arith.constant dense<0.000000e+00> : vector<4x768xf32>
    %12 = tpu.matmul %10, %11, %cst_13 {dimension_numbers = #tpu.dot_dimension_numbers<[1], [0], [0], [1], [0, 0, 1, 1], [], []>} : vector<4x8xf32>, vector<8x768xf32>, vector<4x768xf32> -> vector<4x768xf32>
    %13 = arith.addf %8, %12 : vector<4x768xf32>
    %c3 = arith.constant 3 : index
    %c0_14 = arith.constant 0 : index
    %c0_15 = arith.constant 0 : index
    %14 = vector.load %arg3[%c3, %c0_14, %c0_15] : memref<9x4x8xf32, #tpu.memory_space<vmem>>, vector<1x4x8xf32>
    %15 = vector.shape_cast %14 : vector<1x4x8xf32> to vector<4x8xf32>
    %c0_16 = arith.constant 0 : index
    %c18 = arith.constant 18 : index
    %16 = vector.load %arg1[%c0_16, %c18] : memref<8x896xf32, #tpu.memory_space<vmem>>, vector<8x768xf32>
    %cst_17 = arith.constant dense<0.000000e+00> : vector<4x768xf32>
    %17 = tpu.matmul %15, %16, %cst_17 {dimension_numbers = #tpu.dot_dimension_numbers<[1], [0], [0], [1], [0, 0, 1, 1], [], []>} : vector<4x8xf32>, vector<8x768xf32>, vector<4x768xf32> -> vector<4x768xf32>
    %18 = arith.addf %13, %17 : vector<4x768xf32>
    %c4 = arith.constant 4 : index
    %c0_18 = arith.constant 0 : index
    %c0_19 = arith.constant 0 : index
    %19 = vector.load %arg3[%c4, %c0_18, %c0_19] : memref<9x4x8xf32, #tpu.memory_space<vmem>>, vector<1x4x8xf32>
    %20 = vector.shape_cast %19 : vector<1x4x8xf32> to vector<4x8xf32>
    %c0_20 = arith.constant 0 : index
    %c19 = arith.constant 19 : index
    %21 = vector.load %arg1[%c0_20, %c19] : memref<8x896xf32, #tpu.memory_space<vmem>>, vector<8x768xf32>
    %cst_21 = arith.constant dense<0.000000e+00> : vector<4x768xf32>
    %22 = tpu.matmul %20, %21, %cst_21 {dimension_numbers = #tpu.dot_dimension_numbers<[1], [0], [0], [1], [0, 0, 1, 1], [], []>} : vector<4x8xf32>, vector<8x768xf32>, vector<4x768xf32> -> vector<4x768xf32>
    %23 = arith.addf %18, %22 : vector<4x768xf32>
    %c5 = arith.constant 5 : index
    %c0_22 = arith.constant 0 : index
    %c0_23 = arith.constant 0 : index
    %24 = vector.load %arg3[%c5, %c0_22, %c0_23] : memref<9x4x8xf32, #tpu.memory_space<vmem>>, vector<1x4x8xf32>
    %25 = vector.shape_cast %24 : vector<1x4x8xf32> to vector<4x8xf32>
    %c0_24 = arith.constant 0 : index
    %c20 = arith.constant 20 : index
    %26 = vector.load %arg1[%c0_24, %c20] : memref<8x896xf32, #tpu.memory_space<vmem>>, vector<8x768xf32>
    %cst_25 = arith.constant dense<0.000000e+00> : vector<4x768xf32>
    %27 = tpu.matmul %25, %26, %cst_25 {dimension_numbers = #tpu.dot_dimension_numbers<[1], [0], [0], [1], [0, 0, 1, 1], [], []>} : vector<4x8xf32>, vector<8x768xf32>, vector<4x768xf32> -> vector<4x768xf32>
    %28 = arith.addf %23, %27 : vector<4x768xf32>
    %c6 = arith.constant 6 : index
    %c0_26 = arith.constant 0 : index
    %c0_27 = arith.constant 0 : index
    %29 = vector.load %arg3[%c6, %c0_26, %c0_27] : memref<9x4x8xf32, #tpu.memory_space<vmem>>, vector<1x4x8xf32>
    %30 = vector.shape_cast %29 : vector<1x4x8xf32> to vector<4x8xf32>
    %c0_28 = arith.constant 0 : index
    %c36 = arith.constant 36 : index
    %31 = vector.load %arg1[%c0_28, %c36] : memref<8x896xf32, #tpu.memory_space<vmem>>, vector<8x768xf32>
    %cst_29 = arith.constant dense<0.000000e+00> : vector<4x768xf32>
    %32 = tpu.matmul %30, %31, %cst_29 {dimension_numbers = #tpu.dot_dimension_numbers<[1], [0], [0], [1], [0, 0, 1, 1], [], []>} : vector<4x8xf32>, vector<8x768xf32>, vector<4x768xf32> -> vector<4x768xf32>
    %33 = arith.addf %28, %32 : vector<4x768xf32>
    %c7 = arith.constant 7 : index
    %c0_30 = arith.constant 0 : index
    %c0_31 = arith.constant 0 : index
    %34 = vector.load %arg3[%c7, %c0_30, %c0_31] : memref<9x4x8xf32, #tpu.memory_space<vmem>>, vector<1x4x8xf32>
    %35 = vector.shape_cast %34 : vector<1x4x8xf32> to vector<4x8xf32>
    %c0_32 = arith.constant 0 : index
    %c37 = arith.constant 37 : index
    %36 = vector.load %arg1[%c0_32, %c37] : memref<8x896xf32, #tpu.memory_space<vmem>>, vector<8x768xf32>
    %cst_33 = arith.constant dense<0.000000e+00> : vector<4x768xf32>
    %37 = tpu.matmul %35, %36, %cst_33 {dimension_numbers = #tpu.dot_dimension_numbers<[1], [0], [0], [1], [0, 0, 1, 1], [], []>} : vector<4x8xf32>, vector<8x768xf32>, vector<4x768xf32> -> vector<4x768xf32>
    %38 = arith.addf %33, %37 : vector<4x768xf32>
    %c8 = arith.constant 8 : index
    %c0_34 = arith.constant 0 : index
    %c0_35 = arith.constant 0 : index
    %39 = vector.load %arg3[%c8, %c0_34, %c0_35] : memref<9x4x8xf32, #tpu.memory_space<vmem>>, vector<1x4x8xf32>
    %40 = vector.shape_cast %39 : vector<1x4x8xf32> to vector<4x8xf32>
    %c0_36 = arith.constant 0 : index
    %c38 = arith.constant 38 : index
    %41 = vector.load %arg1[%c0_36, %c38] : memref<8x896xf32, #tpu.memory_space<vmem>>, vector<8x768xf32>
    %cst_37 = arith.constant dense<0.000000e+00> : vector<4x768xf32>
    %42 = tpu.matmul %40, %41, %cst_37 {dimension_numbers = #tpu.dot_dimension_numbers<[1], [0], [0], [1], [0, 0, 1, 1], [], []>} : vector<4x8xf32>, vector<8x768xf32>, vector<4x768xf32> -> vector<4x768xf32>
    %43 = arith.addf %38, %42 : vector<4x768xf32>
    %c0_38 = arith.constant 0 : index
    %c0_39 = arith.constant 0 : index
    %44 = vector.load %arg4[%c0_38, %c0_39] : memref<4x1xf32, #tpu.memory_space<vmem>>, vector<4x1xf32>
    %45 = vector.broadcast %44 : vector<4x1xf32> to vector<4x768xf32>
    %46 = arith.addf %43, %45 : vector<4x768xf32>
    %cst_40 = arith.constant 0.000000e+00 : f32
    %47 = vector.broadcast %cst_40 : f32 to vector<4x768xf32>
    %48 = arith.maximumf %46, %47 : vector<4x768xf32>
    %c0_41 = arith.constant 0 : index
    %c0_42 = arith.constant 0 : index
    %49 = vector.load %arg2[%c0_41, %c0_42] : memref<1x768xf32, #tpu.memory_space<vmem>>, vector<1x768xf32>
    %50 = vector.broadcast %49 : vector<1x768xf32> to vector<4x768xf32>
    %51 = arith.mulf %48, %50 : vector<4x768xf32>
    %cst_43 = arith.constant 0.000000e+00 : f32
    %52 = vector.broadcast %cst_43 : f32 to vector<4x128xf32>
    %c0_44 = arith.constant 0 : index
    %c0_45 = arith.constant 0 : index
    %53 = vector.load %arg8[%c0_44, %c0_45] : memref<4x1024xf32, #tpu.memory_space<vmem>>, vector<4x128xf32>
    tpu.vector_store %arg8[%c0_44, %c0_45], %52 {strides = array<i32>} : memref<4x1024xf32, #tpu.memory_space<vmem>>, vector<4x128xf32>,
    %cst_46 = arith.constant 0.000000e+00 : f32
    %54 = vector.broadcast %cst_46 : f32 to vector<4x128xf32>
    %c0_47 = arith.constant 0 : index
    %c896 = arith.constant 896 : index
    %55 = vector.load %arg8[%c0_47, %c896] : memref<4x1024xf32, #tpu.memory_space<vmem>>, vector<4x128xf32>
    tpu.vector_store %arg8[%c0_47, %c896], %54 {strides = array<i32>} : memref<4x1024xf32, #tpu.memory_space<vmem>>, vector<4x128xf32>,
    %c0_48 = arith.constant 0 : index
    %c128 = arith.constant 128 : index
    %56 = vector.load %arg8[%c0_48, %c128] : memref<4x1024xf32, #tpu.memory_space<vmem>>, vector<4x768xf32>
    tpu.vector_store %arg8[%c0_48, %c128], %51 {strides = array<i32>} : memref<4x1024xf32, #tpu.memory_space<vmem>>, vector<4x768xf32>,
    %c0_49 = arith.constant 0 : index
    %c0_50 = arith.constant 0 : index
    %c0_51 = arith.constant 0 : index
    %57 = vector.load %arg5[%c0_49, %c0_50, %c0_51] : memref<9x4x4xf32, #tpu.memory_space<vmem>>, vector<1x4x4xf32>
    %58 = vector.shape_cast %57 : vector<1x4x4xf32> to vector<4x4xf32>
    %c0_52 = arith.constant 0 : index
    %c109 = arith.constant 109 : index
    %59 = vector.load %arg8[%c0_52, %c109] : memref<4x1024xf32, #tpu.memory_space<vmem>>, vector<4x768xf32>
    %cst_53 = arith.constant dense<0.000000e+00> : vector<4x768xf32>
    %60 = tpu.matmul %58, %59, %cst_53 {dimension_numbers = #tpu.dot_dimension_numbers<[1], [0], [0], [1], [0, 0, 1, 1], [], []>} : vector<4x4xf32>, vector<4x768xf32>, vector<4x768xf32> -> vector<4x768xf32>
    %c1_54 = arith.constant 1 : index
    %c0_55 = arith.constant 0 : index
    %c0_56 = arith.constant 0 : index
    %61 = vector.load %arg5[%c1_54, %c0_55, %c0_56] : memref<9x4x4xf32, #tpu.memory_space<vmem>>, vector<1x4x4xf32>
    %62 = vector.shape_cast %61 : vector<1x4x4xf32> to vector<4x4xf32>
    %c0_57 = arith.constant 0 : index
    %c110 = arith.constant 110 : index
    %63 = vector.load %arg8[%c0_57, %c110] : memref<4x1024xf32, #tpu.memory_space<vmem>>, vector<4x768xf32>
    %cst_58 = arith.constant dense<0.000000e+00> : vector<4x768xf32>
    %64 = tpu.matmul %62, %63, %cst_58 {dimension_numbers = #tpu.dot_dimension_numbers<[1], [0], [0], [1], [0, 0, 1, 1], [], []>} : vector<4x4xf32>, vector<4x768xf32>, vector<4x768xf32> -> vector<4x768xf32>
    %65 = arith.addf %60, %64 : vector<4x768xf32>
    %c2_59 = arith.constant 2 : index
    %c0_60 = arith.constant 0 : index
    %c0_61 = arith.constant 0 : index
    %66 = vector.load %arg5[%c2_59, %c0_60, %c0_61] : memref<9x4x4xf32, #tpu.memory_space<vmem>>, vector<1x4x4xf32>
    %67 = vector.shape_cast %66 : vector<1x4x4xf32> to vector<4x4xf32>
    %c0_62 = arith.constant 0 : index
    %c111 = arith.constant 111 : index
    %68 = vector.load %arg8[%c0_62, %c111] : memref<4x1024xf32, #tpu.memory_space<vmem>>, vector<4x768xf32>
    %cst_63 = arith.constant dense<0.000000e+00> : vector<4x768xf32>
    %69 = tpu.matmul %67, %68, %cst_63 {dimension_numbers = #tpu.dot_dimension_numbers<[1], [0], [0], [1], [0, 0, 1, 1], [], []>} : vector<4x4xf32>, vector<4x768xf32>, vector<4x768xf32> -> vector<4x768xf32>
    %70 = arith.addf %65, %69 : vector<4x768xf32>
    %c3_64 = arith.constant 3 : index
    %c0_65 = arith.constant 0 : index
    %c0_66 = arith.constant 0 : index
    %71 = vector.load %arg5[%c3_64, %c0_65, %c0_66] : memref<9x4x4xf32, #tpu.memory_space<vmem>>, vector<1x4x4xf32>
    %72 = vector.shape_cast %71 : vector<1x4x4xf32> to vector<4x4xf32>
    %c0_67 = arith.constant 0 : index
    %c127 = arith.constant 127 : index
    %73 = vector.load %arg8[%c0_67, %c127] : memref<4x1024xf32, #tpu.memory_space<vmem>>, vector<4x768xf32>
    %cst_68 = arith.constant dense<0.000000e+00> : vector<4x768xf32>
    %74 = tpu.matmul %72, %73, %cst_68 {dimension_numbers = #tpu.dot_dimension_numbers<[1], [0], [0], [1], [0, 0, 1, 1], [], []>} : vector<4x4xf32>, vector<4x768xf32>, vector<4x768xf32> -> vector<4x768xf32>
    %75 = arith.addf %70, %74 : vector<4x768xf32>
    %c4_69 = arith.constant 4 : index
    %c0_70 = arith.constant 0 : index
    %c0_71 = arith.constant 0 : index
    %76 = vector.load %arg5[%c4_69, %c0_70, %c0_71] : memref<9x4x4xf32, #tpu.memory_space<vmem>>, vector<1x4x4xf32>
    %77 = vector.shape_cast %76 : vector<1x4x4xf32> to vector<4x4xf32>
    %c0_72 = arith.constant 0 : index
    %c128_73 = arith.constant 128 : index
    %78 = vector.load %arg8[%c0_72, %c128_73] : memref<4x1024xf32, #tpu.memory_space<vmem>>, vector<4x768xf32>
    %cst_74 = arith.constant dense<0.000000e+00> : vector<4x768xf32>
    %79 = tpu.matmul %77, %78, %cst_74 {dimension_numbers = #tpu.dot_dimension_numbers<[1], [0], [0], [1], [0, 0, 1, 1], [], []>} : vector<4x4xf32>, vector<4x768xf32>, vector<4x768xf32> -> vector<4x768xf32>
    %80 = arith.addf %75, %79 : vector<4x768xf32>
    %c5_75 = arith.constant 5 : index
    %c0_76 = arith.constant 0 : index
    %c0_77 = arith.constant 0 : index
    %81 = vector.load %arg5[%c5_75, %c0_76, %c0_77] : memref<9x4x4xf32, #tpu.memory_space<vmem>>, vector<1x4x4xf32>
    %82 = vector.shape_cast %81 : vector<1x4x4xf32> to vector<4x4xf32>
    %c0_78 = arith.constant 0 : index
    %c129 = arith.constant 129 : index
    %83 = vector.load %arg8[%c0_78, %c129] : memref<4x1024xf32, #tpu.memory_space<vmem>>, vector<4x768xf32>
    %cst_79 = arith.constant dense<0.000000e+00> : vector<4x768xf32>
    %84 = tpu.matmul %82, %83, %cst_79 {dimension_numbers = #tpu.dot_dimension_numbers<[1], [0], [0], [1], [0, 0, 1, 1], [], []>} : vector<4x4xf32>, vector<4x768xf32>, vector<4x768xf32> -> vector<4x768xf32>
    %85 = arith.addf %80, %84 : vector<4x768xf32>
    %c6_80 = arith.constant 6 : index
    %c0_81 = arith.constant 0 : index
    %c0_82 = arith.constant 0 : index
    %86 = vector.load %arg5[%c6_80, %c0_81, %c0_82] : memref<9x4x4xf32, #tpu.memory_space<vmem>>, vector<1x4x4xf32>
    %87 = vector.shape_cast %86 : vector<1x4x4xf32> to vector<4x4xf32>
    %c0_83 = arith.constant 0 : index
    %c145 = arith.constant 145 : index
    %88 = vector.load %arg8[%c0_83, %c145] : memref<4x1024xf32, #tpu.memory_space<vmem>>, vector<4x768xf32>
    %cst_84 = arith.constant dense<0.000000e+00> : vector<4x768xf32>
    %89 = tpu.matmul %87, %88, %cst_84 {dimension_numbers = #tpu.dot_dimension_numbers<[1], [0], [0], [1], [0, 0, 1, 1], [], []>} : vector<4x4xf32>, vector<4x768xf32>, vector<4x768xf32> -> vector<4x768xf32>
    %90 = arith.addf %85, %89 : vector<4x768xf32>
    %c7_85 = arith.constant 7 : index
    %c0_86 = arith.constant 0 : index
    %c0_87 = arith.constant 0 : index
    %91 = vector.load %arg5[%c7_85, %c0_86, %c0_87] : memref<9x4x4xf32, #tpu.memory_space<vmem>>, vector<1x4x4xf32>
    %92 = vector.shape_cast %91 : vector<1x4x4xf32> to vector<4x4xf32>
    %c0_88 = arith.constant 0 : index
    %c146 = arith.constant 146 : index
    %93 = vector.load %arg8[%c0_88, %c146] : memref<4x1024xf32, #tpu.memory_space<vmem>>, vector<4x768xf32>
    %cst_89 = arith.constant dense<0.000000e+00> : vector<4x768xf32>
    %94 = tpu.matmul %92, %93, %cst_89 {dimension_numbers = #tpu.dot_dimension_numbers<[1], [0], [0], [1], [0, 0, 1, 1], [], []>} : vector<4x4xf32>, vector<4x768xf32>, vector<4x768xf32> -> vector<4x768xf32>
    %95 = arith.addf %90, %94 : vector<4x768xf32>
    %c8_90 = arith.constant 8 : index
    %c0_91 = arith.constant 0 : index
    %c0_92 = arith.constant 0 : index
    %96 = vector.load %arg5[%c8_90, %c0_91, %c0_92] : memref<9x4x4xf32, #tpu.memory_space<vmem>>, vector<1x4x4xf32>
    %97 = vector.shape_cast %96 : vector<1x4x4xf32> to vector<4x4xf32>
    %c0_93 = arith.constant 0 : index
    %c147 = arith.constant 147 : index
    %98 = vector.load %arg8[%c0_93, %c147] : memref<4x1024xf32, #tpu.memory_space<vmem>>, vector<4x768xf32>
    %cst_94 = arith.constant dense<0.000000e+00> : vector<4x768xf32>
    %99 = tpu.matmul %97, %98, %cst_94 {dimension_numbers = #tpu.dot_dimension_numbers<[1], [0], [0], [1], [0, 0, 1, 1], [], []>} : vector<4x4xf32>, vector<4x768xf32>, vector<4x768xf32> -> vector<4x768xf32>
    %100 = arith.addf %95, %99 : vector<4x768xf32>
    %c0_95 = arith.constant 0 : index
    %c0_96 = arith.constant 0 : index
    %101 = vector.load %arg6[%c0_95, %c0_96] : memref<4x1xf32, #tpu.memory_space<vmem>>, vector<4x1xf32>
    %102 = vector.broadcast %101 : vector<4x1xf32> to vector<4x768xf32>
    %103 = arith.addf %100, %102 : vector<4x768xf32>
    %cst_97 = arith.constant 0.000000e+00 : f32
    %104 = vector.broadcast %cst_97 : f32 to vector<4x768xf32>
    %105 = arith.maximumf %103, %104 : vector<4x768xf32>
    %c0_98 = arith.constant 0 : index
    %c0_99 = arith.constant 0 : index
    %106 = vector.load %arg7[%c0_98, %c0_99] : memref<4x768xf32, #tpu.memory_space<vmem>>, vector<4x768xf32>
    tpu.vector_store %arg7[%c0_98, %c0_99], %105 {strides = array<i32>} : memref<4x768xf32, #tpu.memory_space<vmem>>, vector<4x768xf32>,
    return
  }
  func.func @transform_0(%arg0: i32) -> (i32, i32) {
    %c0_i32 = arith.constant 0 : i32
    %c0_i32_0 = arith.constant 0 : i32
    %c0_i32_1 = arith.constant 0 : i32
    return %c0_i32, %c0_i32_0 : i32, i32
  }
  func.func @transform_1(%arg0: i32) -> (i32, i32) {
    %c0_i32 = arith.constant 0 : i32
    %c0_i32_0 = arith.constant 0 : i32
    %c0_i32_1 = arith.constant 0 : i32
    return %c0_i32, %c0_i32_0 : i32, i32
  }
  func.func @transform_2(%arg0: i32) -> (i32, i32, i32) {
    %c0_i32 = arith.constant 0 : i32
    %c0_i32_0 = arith.constant 0 : i32
    %c0_i32_1 = arith.constant 0 : i32
    %c0_i32_2 = arith.constant 0 : i32
    return %c0_i32, %c0_i32_0, %c0_i32_1 : i32, i32, i32
  }
  func.func @transform_3(%arg0: i32) -> (i32, i32) {
    %c0_i32 = arith.constant 0 : i32
    %c0_i32_0 = arith.constant 0 : i32
    %c0_i32_1 = arith.constant 0 : i32
    return %c0_i32, %c0_i32_0 : i32, i32
  }
  func.func @transform_4(%arg0: i32) -> (i32, i32, i32) {
    %c0_i32 = arith.constant 0 : i32
    %c0_i32_0 = arith.constant 0 : i32
    %c0_i32_1 = arith.constant 0 : i32
    %c0_i32_2 = arith.constant 0 : i32
    return %c0_i32, %c0_i32_0, %c0_i32_1 : i32, i32, i32
  }
  func.func @transform_5(%arg0: i32) -> (i32, i32) {
    %c0_i32 = arith.constant 0 : i32
    %c0_i32_0 = arith.constant 0 : i32
    %c0_i32_1 = arith.constant 0 : i32
    return %c0_i32, %c0_i32_0 : i32, i32
  }
  func.func @transform_6(%arg0: i32) -> (i32, i32) {
    %c0_i32 = arith.constant 0 : i32
    %c0_i32_0 = arith.constant 0 : i32
    %c0_i32_1 = arith.constant 0 : i32
    return %c0_i32, %c0_i32_0 : i32, i32
  }
}

</mosaic_0001>

<bundles_post_ra>
// kernel: decoder_forward.1
= control target key start
LH: loop header
LB: loop body
LE: loop exit
PB: predicated region body
PF: predicated region fallthrough
CT: control target
= control target key end

     0   :  { %v4979_v2 = vmov 0.0   ;;  %s4980_s25 = smov 127   ;;  %s4981_s12 = smov 126   ;;  %v4988_v8 = vmov 0   ;;  %vm60_vm0 = vcmask 1039360   ;;  %vm73_vm1 = vcmask 64512   ;;  %s5535_s0 = inlined_call_operand.vmem [shape: f32[8,896], index: 0, kind: input, shape index: {}]   ;;  %s5536_s3 = inlined_call_operand.vmem [shape: f32[4,1], index: 3, kind: input, shape index: {}]   ;;  %s5537_s2 = inlined_call_operand.vmem [shape: f32[9,4,8], index: 2, kind: input, shape index: {}]   ;;  %s5538_s1 = inlined_call_operand.vmem [shape: f32[1,768], index: 1, kind: input, shape index: {}]   ;;  %s5539_s5 = inlined_call_operand.vmem [shape: f32[4,1], index: 5, kind: input, shape index: {}]   ;;  %s5540_s4 = inlined_call_operand.vmem [shape: f32[9,4,4], index: 4, kind: input, shape index: {}]   ;;  %s5541_s6 = inlined_call_operand.vmem [shape: f32[4,768], index: 6, kind: output, shape index: {}]  }
   0x1   :  { %v5032_v0 = vld [vmem:[%s5535_s0 + $0x8] sm:$0xff]  ;;  %v5037_v1 = vld [vmem:[%s5535_s0] sm:$0xff]  ;;  %141 = vmatprep.mubr.f32.mxu0 %v4979_v2  ;;  %2319 = vst [vmem:[#allocation2] sm:$0xf] %v4979_v2  ;;  %2320 = vst [vmem:[#allocation2 + $0x1c] sm:$0xf] %v4979_v2  ;;  %2452 = vmatprep.mubr.f32.mxu1 %v4979_v2 }
   0x2   :  { %48 = vrot.lane.b32.xlu0 %v5032_v0, %s4980_s25  ;;  %46 = vrot.lane.b32.xlu1 %v5037_v1, %s4980_s25  ;;  %v5050_v3 = vld [vmem:[%s5535_s0 + $0x10] sm:$0xff]  ;;  %v5055_v4 = vld [vmem:[%s5535_s0 + $0x18] sm:$0xff]  ;;  %s4982_s13 = smov 110   ;;  %s4984_s14 = smov 108   ;;  %vm522_vm2 = vcmask 1031168   ;;  %vm773_vm3 = vcmask 900096  }
   0x3   :  { %v5064_v5 = vld [vmem:[%s5535_s0 + $0x20] sm:$0xff]  ;;  %v5069_v6 = vld [vmem:[%s5535_s0 + $0x28] sm:$0xff]  ;;  %v38_v7 = vld [vmem:[%s5535_s0 + $0x30] sm:$0xff]  ;;  %s4983_s0 = smov 109   ;;  %s4985_s15 = smov 92   ;;  %4972 = vset.pattern.permute.xlu0 %v4988_v8  ;;  %vm1024_vm4 = vcmask 891904  }
   0x4   :  { %s4986_s16 = smov 91   ;;  %s4987_s17 = smov 90   ;;  %v2263_v9 = vld [vmem:[%s5536_s3] sm:$0xf]  ;;  %v4737_v15 = vld [vmem:[%s5537_s2 + $0x4] sm:$0xf] }
   0x5   :  { %v23_v27 = vld [vmem:[%s5537_s2] sm:$0xf]  ;;  %v4744_v37 = vld [vmem:[%s5537_s2 + $0x8] sm:$0xf]  ;;  %v4748_v50 = vld [vmem:[%s5537_s2 + $0xc] sm:$0xf] }
   0x6   :  { %50 = vrot.lane.b32.xlu0 %v5050_v3, %s4980_s25  ;;  %52 = vrot.lane.b32.xlu1 %v5055_v4, %s4980_s25  ;;  %v4752_v63 = vld [vmem:[%s5537_s2 + $0x10] sm:$0xf]  ;;  %vm1275_vm5 = vcmask 883712   ;;  %vm1526_vm6 = vcmask 752640   ;;  %vm1777_vm7 = vcmask 744448   ;;  %vm2028_vm8 = vcmask 736256  }
   0x7   :  { %s4992_s18 = smov 1   ;;  %s4993_s19 = smov 111   ;;  %vm2364_vm9 = vcmask 146432   ;;  %vm2375_vm10 = vcmask 1043456   ;;  %vm2371_vm11 = vcmask 31744   ;;  %vm2615_vm12 = vcmask 154624  }
   0x8   :  { %vm2877_vm13 = vcmask 138240   ;;  %vm3145_vm14 = vcmask 7168   ;;  %vm3925_vm15 = vcmask 908288  }
   0xa   :  { %54 = vrot.lane.b32.xlu0 %v5064_v5, %s4980_s25  ;;  %56 = vrot.lane.b32.xlu1 %v5069_v6, %s4980_s25 }
   0xe   :  { %58 = vrot.lane.b32.xlu0 %v38_v7, %s4980_s25  ;;  %510 = vrot.lane.b32.xlu1 %v5032_v0, %s4981_s12 }
  0x12   :  { %512 = vrot.lane.b32.xlu0 %v5050_v3, %s4981_s12  ;;  %508 = vrot.lane.b32.xlu1 %v5037_v1, %s4981_s12 }
  0x16   :  { %514 = vrot.lane.b32.xlu0 %v5055_v4, %s4981_s12  ;;  %516 = vrot.lane.b32.xlu1 %v5064_v5, %s4981_s12 }
  0x1a   :  { %518 = vrot.lane.b32.xlu0 %v5069_v6, %s4981_s12  ;;  %520 = vrot.lane.b32.xlu1 %v38_v7, %s4981_s12 }
  0x1e   :  { %761 = vrot.lane.b32.xlu0 %v5032_v0, %s4982_s13  ;;  %763 = vrot.lane.b32.xlu1 %v5050_v3, %s4982_s13 }
  0x22   :  { %759 = vrot.lane.b32.xlu0 %v5037_v1, %s4982_s13  ;;  %765 = vrot.lane.b32.xlu1 %v5055_v4, %s4982_s13 }
  0x26   :  { %767 = vrot.lane.b32.xlu0 %v5064_v5, %s4982_s13  ;;  %769 = vrot.lane.b32.xlu1 %v5069_v6, %s4982_s13 }
  0x2a   :  { %771 = vrot.lane.b32.xlu0 %v38_v7, %s4982_s13  ;;  %1012 = vrot.lane.b32.xlu1 %v5032_v0, %s4983_s0 }
  0x2e   :  { %1014 = vrot.lane.b32.xlu0 %v5050_v3, %s4983_s0  ;;  %1010 = vrot.lane.b32.xlu1 %v5037_v1, %s4983_s0 }
  0x32   :  { %1016 = vrot.lane.b32.xlu0 %v5055_v4, %s4983_s0  ;;  %1018 = vrot.lane.b32.xlu1 %v5064_v5, %s4983_s0 }
  0x36   :  { %1020 = vrot.lane.b32.xlu0 %v5069_v6, %s4983_s0  ;;  %1022 = vrot.lane.b32.xlu1 %v38_v7, %s4983_s0 }
  0x3a   :  { %1263 = vrot.lane.b32.xlu0 %v5032_v0, %s4984_s14  ;;  %1265 = vrot.lane.b32.xlu1 %v5050_v3, %s4984_s14 }
  0x3e   :  { %1261 = vrot.lane.b32.xlu0 %v5037_v1, %s4984_s14  ;;  %1267 = vrot.lane.b32.xlu1 %v5055_v4, %s4984_s14 }
  0x42   :  { %1269 = vrot.lane.b32.xlu0 %v5064_v5, %s4984_s14  ;;  %1271 = vrot.lane.b32.xlu1 %v5069_v6, %s4984_s14 }
  0x46   :  { %1273 = vrot.lane.b32.xlu0 %v38_v7, %s4984_s14  ;;  %1514 = vrot.lane.b32.xlu1 %v5032_v0, %s4985_s15 }
  0x4a   :  { %1516 = vrot.lane.b32.xlu0 %v5050_v3, %s4985_s15  ;;  %1512 = vrot.lane.b32.xlu1 %v5037_v1, %s4985_s15 }
  0x4e   :  { %1518 = vrot.lane.b32.xlu0 %v5055_v4, %s4985_s15  ;;  %1520 = vrot.lane.b32.xlu1 %v5064_v5, %s4985_s15 }
  0x52   :  { %1522 = vrot.lane.b32.xlu0 %v5069_v6, %s4985_s15  ;;  %1524 = vrot.lane.b32.xlu1 %v38_v7, %s4985_s15 }
  0x56   :  { %1765 = vrot.lane.b32.xlu0 %v5032_v0, %s4986_s16  ;;  %1767 = vrot.lane.b32.xlu1 %v5050_v3, %s4986_s16 }
  0x5a   :  { %1763 = vrot.lane.b32.xlu0 %v5037_v1, %s4986_s16  ;;  %1769 = vrot.lane.b32.xlu1 %v5055_v4, %s4986_s16 }
  0x5e   :  { %1771 = vrot.lane.b32.xlu0 %v5064_v5, %s4986_s16  ;;  %1773 = vrot.lane.b32.xlu1 %v5069_v6, %s4986_s16 }
  0x62   :  { %1775 = vrot.lane.b32.xlu0 %v38_v7, %s4986_s16  ;;  %2016 = vrot.lane.b32.xlu1 %v5032_v0, %s4987_s17  ;;  %s4990_s16 = smov 18  }
  0x66   :  { %2018 = vrot.lane.b32.xlu0 %v5050_v3, %s4987_s17  ;;  %2014 = vrot.lane.b32.xlu1 %v5037_v1, %s4987_s17 }
  0x6a   :  { %2020 = vrot.lane.b32.xlu0 %v5055_v4, %s4987_s17  ;;  %2022 = vrot.lane.b32.xlu1 %v5064_v5, %s4987_s17 }
  0x6e   :  { %2024 = vrot.lane.b32.xlu0 %v5069_v6, %s4987_s17  ;;  %2026 = vrot.lane.b32.xlu1 %v38_v7, %s4987_s17  ;;  %s4991_s17 = smov 17  }
  0x72   :  { %2266 = vperm.xlu0 %4972, %v2263_v9  }
  0x74   :  { %v49_v10 = vpop.permute.xlu0 %48  ;;  %v47_v11 = vpop.permute.xlu1 %46 }
  0x75   :  { %v61_v16 = vsel %vm60_vm0, %v47_v11, %v49_v10 }
  0x78   :  { %v51_v12 = vpop.permute.xlu0 %50  ;;  %v53_v13 = vpop.permute.xlu1 %52 }
  0x79   :  { %v62_v14 = vsel %vm60_vm0, %v49_v10, %v51_v12  ;;  %v63_v20 = vsel %vm60_vm0, %v51_v12, %v53_v13 }
  0x7a   :  { %77 = vmatprep.subr.mxu0 %v62_v14 }
  0x7b   :  { %78 = vmatpush1.msra.mxu0 %v61_v16 }
  0x7c   :  { %v55_v17 = vpop.permute.xlu0 %54  ;;  %4738 = vmatmul.mubr.msk.f32.vlgmr.msra.gmra.mrb[0].mxu0 %vm73_vm1, %v4737_v15  ;;  %v57_v18 = vpop.permute.xlu1 %56 }
  0x7d   :  { %v64_v19 = vsel %vm60_vm0, %v53_v13, %v55_v17  ;;  %212 = vmatprep.mubr.f32.mxu0 %v4979_v2  ;;  %v65_v24 = vsel %vm60_vm0, %v55_v17, %v57_v18  ;;  %v4756_v13 = vld [vmem:[%s5537_s2 + $0x14] sm:$0xf] }
  0x7e   :  { %148 = vmatprep.subr.mxu0 %v64_v19 }
  0x7f   :  { %149 = vmatpush1.msra.mxu0 %v63_v20 }
  0x80   :  { %v59_v21 = vpop.permute.xlu0 %58  ;;  %4739 = vmatmul.mubr.msk.f32.vlgmr.msra.gmra.mrb[2].mxu0 %vm73_vm1, %v4737_v15  ;;  %v511_v22 = vpop.permute.xlu1 %510 }
  0x81   :  { %v66_v23 = vsel %vm60_vm0, %v57_v18, %v59_v21  ;;  %283 = vmatprep.mubr.f32.mxu0 %v4979_v2 }
  0x82   :  { %219 = vmatprep.subr.mxu0 %v66_v23 }
  0x83   :  { %220 = vmatpush1.msra.mxu0 %v65_v24 }
  0x84   :  { %v513_v25 = vpop.permute.xlu0 %512  ;;  %4740 = vmatmul.mubr.msk.f32.vlgmr.msra.gmra.mrb[4].mxu0 %vm73_vm1, %v4737_v15  ;;  %v509_v26 = vpop.permute.xlu1 %508  ;;  %293 = vmatprep.subr.mxu0 %v5032_v0 }
  0x85   :  { %294 = vmatpush1.msra.mxu0 %v5037_v1  ;;  %357 = vmatprep.mubr.f32.mxu0 %v4979_v2  ;;  %v524_v32 = vsel %vm522_vm2, %v511_v22, %v513_v25  ;;  %v523_v33 = vsel %vm522_vm2, %v509_v26, %v511_v22  ;;  %v4760_v26 = vld [vmem:[%s5537_s2 + $0x18] sm:$0xf] }
  0x86   :  { %364 = vmatprep.subr.mxu0 %v5055_v4 }
  0x88   :  { %v515_v28 = vpop.permute.xlu0 %514  ;;  %v517_v29 = vpop.permute.xlu1 %516  ;;  %4741 = vmatmul.mubr.msk.f32.vlgmr.msra.gmra.mrb[0].mxu0 %vm73_vm1, %v23_v27 }
  0x89   :  { %365 = vmatpush1.msra.mxu0 %v5050_v3  ;;  %428 = vmatprep.mubr.f32.mxu0 %v4979_v2  ;;  %v526_v36 = vsel %vm522_vm2, %v515_v28, %v517_v29  ;;  %v525_v40 = vsel %vm522_vm2, %v513_v25, %v515_v28 }
  0x8a   :  { %435 = vmatprep.subr.mxu0 %v5069_v6 }
  0x8c   :  { %v519_v30 = vpop.permute.xlu0 %518  ;;  %v521_v31 = vpop.permute.xlu1 %520  ;;  %4742 = vmatmul.mubr.msk.f32.vlgmr.msra.gmra.mrb[2].mxu0 %vm73_vm1, %v23_v27 }
  0x8d   :  { %436 = vmatpush1.msra.mxu0 %v5064_v5  ;;  %499 = vmatprep.mubr.f32.mxu0 %v4979_v2  ;;  %v528_v41 = vsel %vm522_vm2, %v519_v30, %v521_v31  ;;  %v527_v44 = vsel %vm522_vm2, %v517_v29, %v519_v30 }
  0x8e   :  { %538 = vmatprep.subr.mxu0 %v524_v32 }
  0x90   :  { %v762_v34 = vpop.permute.xlu0 %761  ;;  %v764_v35 = vpop.permute.xlu1 %763  ;;  %4743 = vmatmul.mubr.msk.f32.vlgmr.msra.gmra.mrb[4].mxu0 %vm73_vm1, %v23_v27 }
  0x91   :  { %539 = vmatpush1.msra.mxu0 %v523_v33  ;;  %602 = vmatprep.mubr.f32.mxu0 %v4979_v2  ;;  %v775_v45 = vsel %vm773_vm3, %v762_v34, %v764_v35 }
  0x92   :  { %609 = vmatprep.subr.mxu0 %v526_v36 }
  0x94   :  { %v760_v38 = vpop.permute.xlu0 %759  ;;  %v766_v39 = vpop.permute.xlu1 %765  ;;  %4745 = vmatmul.mubr.msk.f32.vlgmr.msra.gmra.mrb[0].mxu0 %vm73_vm1, %v4744_v37 }
  0x95   :  { %610 = vmatpush1.msra.mxu0 %v525_v40  ;;  %673 = vmatprep.mubr.f32.mxu0 %v4979_v2  ;;  %v774_v46 = vsel %vm773_vm3, %v760_v38, %v762_v34  ;;  %v776_v51 = vsel %vm773_vm3, %v764_v35, %v766_v39  ;;  %v4764_v38 = vld [vmem:[%s5537_s2 + $0x1c] sm:$0xf] }
  0x96   :  { %680 = vmatprep.subr.mxu0 %v528_v41 }
  0x98   :  { %v768_v42 = vpop.permute.xlu0 %767  ;;  %v770_v43 = vpop.permute.xlu1 %769  ;;  %4746 = vmatmul.mubr.msk.f32.vlgmr.msra.gmra.mrb[2].mxu0 %vm73_vm1, %v4744_v37 }
  0x99   :  { %681 = vmatpush1.msra.mxu0 %v527_v44  ;;  %744 = vmatprep.mubr.f32.mxu0 %v4979_v2  ;;  %v777_v49 = vsel %vm773_vm3, %v766_v39, %v768_v42  ;;  %v778_v55 = vsel %vm773_vm3, %v768_v42, %v770_v43 }
  0x9a   :  { %789 = vmatprep.subr.mxu0 %v775_v45 }
  0x9c   :  { %v772_v47 = vpop.permute.xlu0 %771  ;;  %v1013_v48 = vpop.permute.xlu1 %1012  ;;  %4747 = vmatmul.mubr.msk.f32.vlgmr.msra.gmra.mrb[4].mxu0 %vm73_vm1, %v4744_v37 }
  0x9d   :  { %790 = vmatpush1.msra.mxu0 %v774_v46  ;;  %853 = vmatprep.mubr.f32.mxu0 %v4979_v2  ;;  %v779_v54 = vsel %vm773_vm3, %v770_v43, %v772_v47 }
  0x9e   :  { %860 = vmatprep.subr.mxu0 %v777_v49 }
  0xa0   :  { %v1015_v52 = vpop.permute.xlu0 %1014  ;;  %v1011_v53 = vpop.permute.xlu1 %1010  ;;  %4749 = vmatmul.mubr.msk.f32.vlgmr.msra.gmra.mrb[0].mxu0 %vm73_vm1, %v4748_v50 }
  0xa1   :  { %861 = vmatpush1.msra.mxu0 %v776_v51  ;;  %924 = vmatprep.mubr.f32.mxu0 %v4979_v2  ;;  %v1026_v58 = vsel %vm1024_vm4, %v1013_v48, %v1015_v52  ;;  %v1025_v59 = vsel %vm1024_vm4, %v1011_v53, %v1013_v48  ;;  %v4768_v51 = vld [vmem:[%s5537_s2 + $0x20] sm:$0xf] }
  0xa2   :  { %931 = vmatprep.subr.mxu0 %v779_v54 }
  0xa4   :  { %v1017_v56 = vpop.permute.xlu0 %1016  ;;  %v1019_v57 = vpop.permute.xlu1 %1018  ;;  %4750 = vmatmul.mubr.msk.f32.vlgmr.msra.gmra.mrb[2].mxu0 %vm73_vm1, %v4748_v50 }
  0xa5   :  { %932 = vmatpush1.msra.mxu0 %v778_v55  ;;  %995 = vmatprep.mubr.f32.mxu0 %v4979_v2  ;;  %v1028_v62 = vsel %vm1024_vm4, %v1017_v56, %v1019_v57  ;;  %v1027_v0 = vsel %vm1024_vm4, %v1015_v52, %v1017_v56 }
  0xa6   :  { %1040 = vmatprep.subr.mxu0 %v1026_v58 }
  0xa8   :  { %v1021_v60 = vpop.permute.xlu0 %1020  ;;  %v1023_v61 = vpop.permute.xlu1 %1022  ;;  %4751 = vmatmul.mubr.msk.f32.vlgmr.msra.gmra.mrb[4].mxu0 %vm73_vm1, %v4748_v50 }
  0xa9   :  { %1041 = vmatpush1.msra.mxu0 %v1025_v59  ;;  %1104 = vmatprep.mubr.f32.mxu0 %v4979_v2  ;;  %v1030_v4 = vsel %vm1024_vm4, %v1021_v60, %v1023_v61  ;;  %v1029_v5 = vsel %vm1024_vm4, %v1019_v57, %v1021_v60  ;;  %v2283_v60 = vlaneseq }
  0xaa   :  { %1111 = vmatprep.subr.mxu0 %v1028_v62 }
  0xab   :  { %v2284_v61 = vshrl.u32 %v2283_v60, 7 }
  0xac   :  { %v1264_v1 = vpop.permute.xlu0 %1263  ;;  %v1266_v3 = vpop.permute.xlu1 %1265  ;;  %4753 = vmatmul.mubr.msk.f32.vlgmr.msra.gmra.mrb[0].mxu0 %vm73_vm1, %v4752_v63 }
  0xad   :  { %1112 = vmatpush1.msra.mxu0 %v1027_v0  ;;  %1175 = vmatprep.mubr.f32.mxu0 %v4979_v2  ;;  %v1277_v8 = vsel %vm1275_vm5, %v1264_v1, %v1266_v3  ;;  %v2285_v62 = vsub.s32 0, %v2284_v61  ;;  %v2281_v0 = vld [vmem:[%s5538_s1] sm:$0x3f]  ;;  %s4989_s1 = smov 19  }
  0xae   :  { %1182 = vmatprep.subr.mxu0 %v1030_v4 }
  0xb0   :  { %v1262_v6 = vpop.permute.xlu0 %1261  ;;  %v1268_v7 = vpop.permute.xlu1 %1267  ;;  %4754 = vmatmul.mubr.msk.f32.vlgmr.msra.gmra.mrb[2].mxu0 %vm73_vm1, %v4752_v63 }
  0xb1   :  { %1183 = vmatpush1.msra.mxu0 %v1029_v5  ;;  %1246 = vmatprep.mubr.f32.mxu0 %v4979_v2  ;;  %v1276_v9 = vsel %vm1275_vm5, %v1262_v6, %v1264_v1  ;;  %v1278_v14 = vsel %vm1275_vm5, %v1266_v3, %v1268_v7  ;;  %v2289_v1 = vsub.s32 1, %v2284_v61  ;;  %v2286_v5 = vrot.slane %v2281_v0, %v2285_v62 }
  0xb2   :  { %1291 = vmatprep.subr.mxu0 %v1277_v8 }
  0xb4   :  { %v1270_v10 = vpop.permute.xlu0 %1269  ;;  %v1272_v11 = vpop.permute.xlu1 %1271  ;;  %4755 = vmatmul.mubr.msk.f32.vlgmr.msra.gmra.mrb[4].mxu0 %vm73_vm1, %v4752_v63 }
  0xb5   :  { %1292 = vmatpush1.msra.mxu0 %v1276_v9  ;;  %v1279_v12 = vsel %vm1275_vm5, %v1268_v7, %v1270_v10  ;;  %1355 = vmatprep.mubr.f32.mxu0 %v4979_v2  ;;  %v1280_v18 = vsel %vm1275_vm5, %v1270_v10, %v1272_v11  ;;  %v2293_v7 = vsub.s32 2, %v2284_v61  ;;  %v2290_v9 = vrot.slane %v2281_v0, %v2289_v1 }
  0xb6   :  { %1362 = vmatprep.subr.mxu0 %v1279_v12  ;;  %v2297_v10 = vsub.s32 3, %v2284_v61 }
  0xb8   :  { %v1274_v15 = vpop.permute.xlu0 %1273  ;;  %v1515_v16 = vpop.permute.xlu1 %1514  ;;  %4757 = vmatmul.mubr.msk.f32.vlgmr.msra.gmra.mrb[0].mxu0 %vm73_vm1, %v4756_v13 }
  0xb9   :  { %1363 = vmatpush1.msra.mxu0 %v1278_v14  ;;  %v1281_v17 = vsel %vm1275_vm5, %v1272_v11, %v1274_v15  ;;  %1426 = vmatprep.mubr.f32.mxu0 %v4979_v2 }
  0xba   :  { %1433 = vmatprep.subr.mxu0 %v1281_v17 }
  0xbc   :  { %v1517_v19 = vpop.permute.xlu0 %1516  ;;  %v1513_v20 = vpop.permute.xlu1 %1512  ;;  %4758 = vmatmul.mubr.msk.f32.vlgmr.msra.gmra.mrb[2].mxu0 %vm73_vm1, %v4756_v13 }
  0xbd   :  { %1434 = vmatpush1.msra.mxu0 %v1280_v18  ;;  %v1528_v21 = vsel %vm1526_vm6, %v1515_v16, %v1517_v19  ;;  %1497 = vmatprep.mubr.f32.mxu0 %v4979_v2  ;;  %v1527_v22 = vsel %vm1526_vm6, %v1513_v20, %v1515_v16  ;;  %v2294_v16 = vrot.slane %v2281_v0, %v2293_v7  ;;  %v2301_v18 = vsub.s32 4, %v2284_v61 }
  0xbe   :  { %1542 = vmatprep.subr.mxu0 %v1528_v21  ;;  %v2298_v21 = vrot.slane %v2281_v0, %v2297_v10 }
  0xc0   :  { %v1519_v23 = vpop.permute.xlu0 %1518  ;;  %v1521_v24 = vpop.permute.xlu1 %1520  ;;  %4759 = vmatmul.mubr.msk.f32.vlgmr.msra.gmra.mrb[4].mxu0 %vm73_vm1, %v4756_v13 }
  0xc1   :  { %1543 = vmatpush1.msra.mxu0 %v1527_v22  ;;  %v1530_v25 = vsel %vm1526_vm6, %v1519_v23, %v1521_v24  ;;  %1606 = vmatprep.mubr.f32.mxu0 %v4979_v2  ;;  %v1529_v27 = vsel %vm1526_vm6, %v1517_v19, %v1519_v23  ;;  %v2305_v22 = vsub.s32 5, %v2284_v61 }
  0xc2   :  { %1613 = vmatprep.subr.mxu0 %v1530_v25 }
  0xc4   :  { %v1523_v28 = vpop.permute.xlu0 %1522  ;;  %v1525_v29 = vpop.permute.xlu1 %1524  ;;  %4761 = vmatmul.mubr.msk.f32.vlgmr.msra.gmra.mrb[0].mxu0 %vm73_vm1, %v4760_v26 }
  0xc5   :  { %1614 = vmatpush1.msra.mxu0 %v1529_v27  ;;  %v1532_v30 = vsel %vm1526_vm6, %v1523_v28, %v1525_v29  ;;  %1677 = vmatprep.mubr.f32.mxu0 %v4979_v2  ;;  %v1531_v31 = vsel %vm1526_vm6, %v1521_v24, %v1523_v28  ;;  %v2302_v29 = vrot.slane %v2281_v0, %v2301_v18  ;;  %v2336_v18 = vld [vmem:[%s5540_s4] sm:$0xf] }
  0xc6   :  { %1684 = vmatprep.subr.mxu0 %v1532_v30 }
  0xc8   :  { %v1766_v32 = vpop.permute.xlu0 %1765  ;;  %v1768_v33 = vpop.permute.xlu1 %1767  ;;  %4762 = vmatmul.mubr.msk.f32.vlgmr.msra.gmra.mrb[2].mxu0 %vm73_vm1, %v4760_v26 }
  0xc9   :  { %1685 = vmatpush1.msra.mxu0 %v1531_v31  ;;  %v1779_v34 = vsel %vm1777_vm7, %v1766_v32, %v1768_v33  ;;  %1748 = vmatprep.mubr.f32.mxu0 %v4979_v2 }
  0xca   :  { %1793 = vmatprep.subr.mxu0 %v1779_v34 }
  0xcc   :  { %v1764_v35 = vpop.permute.xlu0 %1763  ;;  %v1770_v36 = vpop.permute.xlu1 %1769  ;;  %4763 = vmatmul.mubr.msk.f32.vlgmr.msra.gmra.mrb[4].mxu0 %vm73_vm1, %v4760_v26 }
  0xcd   :  { %v1778_v37 = vsel %vm1777_vm7, %v1764_v35, %v1766_v32  ;;  %1857 = vmatprep.mubr.f32.mxu0 %v4979_v2  ;;  %v1780_v42 = vsel %vm1777_vm7, %v1768_v33, %v1770_v36  ;;  %v2306_v33 = vrot.slane %v2281_v0, %v2305_v22 }
  0xce   :  { %1794 = vmatpush1.msra.mxu0 %v1778_v37 }
  0xd0   :  { %v1772_v39 = vpop.permute.xlu0 %1771  ;;  %v1774_v40 = vpop.permute.xlu1 %1773  ;;  %4765 = vmatmul.mubr.msk.f32.vlgmr.msra.gmra.mrb[0].mxu0 %vm73_vm1, %v4764_v38 }
  0xd1   :  { %v1781_v41 = vsel %vm1777_vm7, %v1770_v36, %v1772_v39  ;;  %1928 = vmatprep.mubr.f32.mxu0 %v4979_v2  ;;  %v1782_v46 = vsel %vm1777_vm7, %v1772_v39, %v1774_v40 }
  0xd2   :  { %1864 = vmatprep.subr.mxu0 %v1781_v41 }
  0xd3   :  { %1865 = vmatpush1.msra.mxu0 %v1780_v42 }
  0xd4   :  { %v1776_v43 = vpop.permute.xlu0 %1775  ;;  %v2017_v44 = vpop.permute.xlu1 %2016  ;;  %4766 = vmatmul.mubr.msk.f32.vlgmr.msra.gmra.mrb[2].mxu0 %vm73_vm1, %v4764_v38 }
  0xd5   :  { %v1783_v45 = vsel %vm1777_vm7, %v1774_v40, %v1776_v43  ;;  %1999 = vmatprep.mubr.f32.mxu0 %v4979_v2 }
  0xd6   :  { %1935 = vmatprep.subr.mxu0 %v1783_v45 }
  0xd7   :  { %1936 = vmatpush1.msra.mxu0 %v1782_v46 }
  0xd8   :  { %v2019_v47 = vpop.permute.xlu0 %2018  ;;  %v2015_v48 = vpop.permute.xlu1 %2014  ;;  %4767 = vmatmul.mubr.msk.f32.vlgmr.msra.gmra.mrb[4].mxu0 %vm73_vm1, %v4764_v38 }
  0xd9   :  { %v2029_v49 = vsel %vm2028_vm8, %v2015_v48, %v2017_v44  ;;  %v2030_v50 = vsel %vm2028_vm8, %v2017_v44, %v2019_v47  ;;  %2108 = vmatprep.mubr.f32.mxu0 %v4979_v2 }
  0xda   :  { %2044 = vmatprep.subr.mxu0 %v2030_v50  ;;  %v3636_v50 = vld [vmem:[#allocation2 + $0x1c] sm:$0xf] }
  0xdb   :  { %2045 = vmatpush1.msra.mxu0 %v2029_v49 }
  0xdc   :  { %v2021_v52 = vpop.permute.xlu0 %2020  ;;  %v2023_v53 = vpop.permute.xlu1 %2022  ;;  %4769 = vmatmul.mubr.msk.f32.vlgmr.msra.gmra.mrb[0].mxu0 %vm73_vm1, %v4768_v51 }
  0xdd   :  { %v2031_v54 = vsel %vm2028_vm8, %v2019_v47, %v2021_v52  ;;  %v2032_v55 = vsel %vm2028_vm8, %v2021_v52, %v2023_v53  ;;  %2179 = vmatprep.mubr.f32.mxu0 %v4979_v2 }
  0xde   :  { %2115 = vmatprep.subr.mxu0 %v2032_v55  ;;  %v4700_v55 = vld [vmem:[%s5539_s5] sm:$0xf] }
  0xdf   :  { %2116 = vmatpush1.msra.mxu0 %v2031_v54  ;;  %v4171_v54 = vld [vmem:[#allocation2 + $0x1c] sm:$0xf] }
  0xe0   :  { %v2025_v56 = vpop.permute.xlu0 %2024  ;;  %v2027_v57 = vpop.permute.xlu1 %2026  ;;  %4770 = vmatmul.mubr.msk.f32.vlgmr.msra.gmra.mrb[2].mxu0 %vm73_vm1, %v4768_v51 }
  0xe1   :  { %v2033_v58 = vsel %vm2028_vm8, %v2023_v53, %v2025_v56  ;;  %v2034_v59 = vsel %vm2028_vm8, %v2025_v56, %v2027_v57  ;;  %2250 = vmatprep.mubr.f32.mxu0 %v4979_v2  ;;  %v3903_v53 = vld [vmem:[#allocation2 + $0x1c] sm:$0xf] }
  0xe2   :  { %2186 = vmatprep.subr.mxu0 %v2034_v59  ;;  %v4438_v56 = vld [vmem:[#allocation2 + $0x1c] sm:$0xf] }
  0xe3   :  { %2187 = vmatpush1.msra.mxu0 %v2033_v58 }
  0xe4   :  { %4771 = vmatmul.mubr.msk.f32.vlgmr.msra.gmra.mrb[4].mxu0 %vm73_vm1, %v4768_v51 }
  0xf1   :  { %v2267_v63 = vpop.permute.xlu0 %2266 }
 0x1af   :  { %v2110_v3 = vpop.f32.mrb[0].mxu0 }
 0x1b0   :  { %v2269_v4 = vadd.f32 %v2267_v63, %v2110_v3  ;;  %v2112_v6 = vpop.f32.mrb[1].mxu0  ;;  %v4772_v3 = vld [vmem:[%s5540_s4 + $0x4] sm:$0xf] }
 0x1b1   :  { %v2270_v8 = vadd.f32 %v2267_v63, %v2112_v6 }
 0x1b2   :  { %v2275_v11 = vmax.f32 %v2269_v4, 0.0 }
 0x1b3   :  { %v2276_v12 = vmax.f32 %v2270_v8, 0.0  ;;  %v2181_v13 = vpop.f32.mrb[2].mxu0 }
 0x1b4   :  { %v2313_v14 = vmul.f32 %v2286_v5, %v2275_v11  ;;  %v2271_v15 = vadd.f32 %v2267_v63, %v2181_v13  ;;  %v2183_v17 = vpop.f32.mrb[3].mxu0 }
 0x1b5   :  { %v2314_v19 = vmul.f32 %v2290_v9, %v2276_v12  ;;  %v2272_v20 = vadd.f32 %v2267_v63, %v2183_v17 }
 0x1b6   :  { %v2277_v23 = vmax.f32 %v2271_v15, 0.0 }
 0x1b7   :  { %v5275_v24 = vcombine.low %v2313_v14, %v2314_v19  ;;  %v2278_v25 = vmax.f32 %v2272_v20, 0.0  ;;  %v2252_v26 = vpop.f32.mrb[4].mxu0  ;;  %v5284_v48 = vcombine.low %v2314_v19, %v2314_v19 }
 0x1b8   :  { %v2315_v27 = vmul.f32 %v2294_v16, %v2277_v23  ;;  %v2273_v28 = vadd.f32 %v2267_v63, %v2252_v26  ;;  %v2254_v30 = vpop.f32.mrb[5].mxu0 }
 0x1b9   :  { %2333 = vst [vmem:[#allocation2 + $0x4] sm:$0xff] %v5275_v24  ;;  %v2316_v31 = vmul.f32 %v2298_v21, %v2278_v25  ;;  %v2274_v32 = vadd.f32 %v2267_v63, %v2254_v30 }
 0x1ba   :  { %v2279_v34 = vmax.f32 %v2273_v28, 0.0 }
 0x1bb   :  { %v5278_v35 = vcombine.low %v2315_v27, %v2316_v31  ;;  %v2280_v36 = vmax.f32 %v2274_v32, 0.0  ;;  %v5294_v51 = vcombine.low %v2316_v31, %v2316_v31  ;;  %v4791_v32 = vld [vmem:[%s5540_s4 + $0x8] sm:$0xf] }
 0x1bc   :  { %v2317_v37 = vmul.f32 %v2302_v29, %v2279_v34 }
 0x1bd   :  { %2334 = vst [vmem:[#allocation2 + $0xc] sm:$0xff] %v5278_v35  ;;  %v2318_v38 = vmul.f32 %v2306_v33, %v2280_v36 }
 0x1bf   :  { %v5281_v39 = vcombine.low %v2317_v37, %v2318_v38  ;;  %v5303_v52 = vcombine.low %v2318_v38, %v2318_v38 }
 0x1c0   :  { %v2337_v40 = vld [vmem:[#allocation2] sm:$0xff] }
 0x1c1   :  { %2335 = vst [vmem:[#allocation2 + $0x14] sm:$0xff] %v5281_v39  ;;  %2601 = vrot.lane.b32.xlu1 %v2337_v40, %s4989_s1  ;;  %2350 = vrot.lane.b32.xlu0 %v2337_v40, %s4990_s16  ;;  %v2347_v41 = vcombine.high %v2337_v40, %v2337_v40 }
 0x1c4   :  { %v2338_v42 = vld [vmem:[#allocation2 + $0x8] sm:$0xff] }
 0x1c5   :  { %2352 = vrot.lane.b32.xlu1 %v2347_v41, %s4990_s16  ;;  %2605 = vrot.lane.b32.xlu0 %v2338_v42, %s4989_s1  ;;  %v2348_v45 = vcombine.high %v2338_v42, %v2338_v42 }
 0x1c8   :  { %v2339_v43 = vld [vmem:[#allocation2 + $0x10] sm:$0xff]  ;;  %v2340_v44 = vld [vmem:[#allocation2 + $0x18] sm:$0xf] }
 0x1c9   :  { %2603 = vrot.lane.b32.xlu1 %v2347_v41, %s4989_s1  ;;  %2358 = vrot.lane.b32.xlu0 %v2339_v43, %s4990_s16  ;;  %v2349_v46 = vcombine.high %v2339_v43, %v2339_v43  ;;  %v2855_v47 = vld [vmem:[#allocation2 + $0x18] sm:$0xf] }
 0x1ca   :  { %v3123_v49 = vld [vmem:[#allocation2 + $0x18] sm:$0xf] }
 0x1cd   :  { %2354 = vrot.lane.b32.xlu1 %v2338_v42, %s4990_s16  ;;  %2362 = vrot.lane.b32.xlu0 %v2340_v44, %s4990_s16 }
 0x1d1   :  { %2356 = vrot.lane.b32.xlu1 %v2348_v45, %s4990_s16  ;;  %2607 = vrot.lane.b32.xlu0 %v2348_v45, %s4989_s1 }
 0x1d5   :  { %2865 = vrot.lane.b32.xlu0 %v2347_v41, %s4991_s17  ;;  %2360 = vrot.lane.b32.xlu1 %v2349_v46, %s4990_s16 }
 0x1d9   :  { %2611 = vrot.lane.b32.xlu0 %v2349_v46, %s4989_s1  ;;  %2609 = vrot.lane.b32.xlu1 %v2339_v43, %s4989_s1 }
 0x1dd   :  { %2863 = vrot.lane.b32.xlu0 %v2337_v40, %s4991_s17  ;;  %2613 = vrot.lane.b32.xlu1 %v2340_v44, %s4989_s1 }
 0x1e1   :  { %2871 = vrot.lane.b32.xlu0 %v2339_v43, %s4991_s17  ;;  %2867 = vrot.lane.b32.xlu1 %v2338_v42, %s4991_s17 }
 0x1e5   :  { %2875 = vrot.lane.b32.xlu0 %v2855_v47, %s4991_s17  ;;  %2869 = vrot.lane.b32.xlu1 %v2348_v45, %s4991_s17 }
 0x1e9   :  { %3135 = vrot.lane.b32.xlu0 %v2338_v42, %s4992_s18  ;;  %3133 = vrot.lane.b32.xlu1 %v2347_v41, %s4992_s18 }
 0x1ed   :  { %3137 = vrot.lane.b32.xlu0 %v2348_v45, %s4992_s18  ;;  %2873 = vrot.lane.b32.xlu1 %v2349_v46, %s4991_s17 }
 0x1f1   :  { %3141 = vrot.lane.b32.xlu0 %v2349_v46, %s4992_s18  ;;  %3131 = vrot.lane.b32.xlu1 %v2337_v40, %s4992_s18  ;;  %v4801_v46 = vld [vmem:[%s5540_s4 + $0xc] sm:$0xf] }
 0x1f5   :  { %3646 = vrot.lane.b32.xlu0 %v5284_v48, %s4980_s25  ;;  %3139 = vrot.lane.b32.xlu1 %v2339_v43, %s4992_s18 }
 0x1f9   :  { %3644 = vrot.lane.b32.xlu0 %v5275_v24, %s4980_s25  ;;  %3143 = vrot.lane.b32.xlu1 %v3123_v49, %s4992_s18 }
 0x1fd   :  { %3652 = vrot.lane.b32.xlu0 %v5281_v39, %s4980_s25  ;;  %3648 = vrot.lane.b32.xlu1 %v5278_v35, %s4980_s25 }
 0x201   :  { %3656 = vrot.lane.b32.xlu0 %v3636_v50, %s4980_s25  ;;  %3650 = vrot.lane.b32.xlu1 %v5294_v51, %s4980_s25 }
 0x205   :  { %3915 = vrot.lane.b32.xlu0 %v5278_v35, %s4993_s19  ;;  %3913 = vrot.lane.b32.xlu1 %v5284_v48, %s4993_s19 }
 0x209   :  { %3917 = vrot.lane.b32.xlu0 %v5294_v51, %s4993_s19  ;;  %3911 = vrot.lane.b32.xlu1 %v5275_v24, %s4993_s19 }
 0x20d   :  { %4181 = vrot.lane.b32.xlu0 %v5284_v48, %s4982_s13  ;;  %3654 = vrot.lane.b32.xlu1 %v5303_v52, %s4980_s25 }
 0x211   :  { %3921 = vrot.lane.b32.xlu0 %v5303_v52, %s4993_s19  ;;  %3919 = vrot.lane.b32.xlu1 %v5281_v39, %s4993_s19 }
 0x215   :  { %4179 = vrot.lane.b32.xlu0 %v5275_v24, %s4982_s13  ;;  %3923 = vrot.lane.b32.xlu1 %v3903_v53, %s4993_s19 }
 0x219   :  { %4187 = vrot.lane.b32.xlu0 %v5281_v39, %s4982_s13  ;;  %4183 = vrot.lane.b32.xlu1 %v5278_v35, %s4982_s13 }
 0x21d   :  { %4191 = vrot.lane.b32.xlu0 %v4171_v54, %s4982_s13  ;;  %4185 = vrot.lane.b32.xlu1 %v5294_v51, %s4982_s13 }
 0x221   :  { %4450 = vrot.lane.b32.xlu0 %v5278_v35, %s4983_s0  ;;  %4448 = vrot.lane.b32.xlu1 %v5284_v48, %s4983_s0 }
 0x225   :  { %4452 = vrot.lane.b32.xlu0 %v5294_v51, %s4983_s0  ;;  %4189 = vrot.lane.b32.xlu1 %v5303_v52, %s4982_s13 }
 0x229   :  { %4456 = vrot.lane.b32.xlu0 %v5303_v52, %s4983_s0  ;;  %4446 = vrot.lane.b32.xlu1 %v5275_v24, %s4983_s0 }
 0x22d   :  { %4703 = vperm.xlu0 %4972, %v4700_v55   ;;  %4454 = vrot.lane.b32.xlu1 %v5281_v39, %s4983_s0 }
 0x231   :  { %4458 = vrot.lane.b32.xlu1 %v4438_v56, %s4983_s0 }
 0x233   :  { %v2602_v57 = vpop.permute.xlu1 %2601  ;;  %v2351_v58 = vpop.permute.xlu0 %2350 }
 0x237   :  { %v2353_v59 = vpop.permute.xlu1 %2352  ;;  %v2606_v60 = vpop.permute.xlu0 %2605 }
 0x238   :  { %v2365_v4 = vsel %vm2364_vm9, %v2351_v58, %v2353_v59 }
 0x23b   :  { %v2604_v61 = vpop.permute.xlu1 %2603  ;;  %v2359_v62 = vpop.permute.xlu0 %2358 }
 0x23c   :  { %v2617_v13 = vsel %vm2615_vm12, %v2604_v61, %v2606_v60  ;;  %v2616_v14 = vsel %vm2615_vm12, %v2602_v57, %v2604_v61 }
 0x23f   :  { %v2355_v63 = vpop.permute.xlu1 %2354  ;;  %v2363_v0 = vpop.permute.xlu0 %2362 }
 0x240   :  { %v2366_v1 = vsel %vm2364_vm9, %v2353_v59, %v2355_v63 }
 0x241   :  { %4773 = vmatprep.subr.msk.mxu1 %vm2375_vm10, %v2366_v1 }
 0x242   :  { %4774 = vmatpush1.msk.msra.mxu1 %vm2375_vm10, %v2365_v4 }
 0x243   :  { %4775 = vmatmul.mubr.msk.f32.vlgmr.msra.gmra.mrb[0].mxu1 %vm2371_vm11, %v4772_v3  ;;  %v2357_v5 = vpop.permute.xlu1 %2356  ;;  %v2608_v6 = vpop.permute.xlu0 %2607 }
 0x244   :  { %v2367_v7 = vsel %vm2364_vm9, %v2355_v63, %v2357_v5  ;;  %v2368_v8 = vsel %vm2364_vm9, %v2357_v5, %v2359_v62  ;;  %2523 = vmatprep.mubr.f32.mxu1 %v4979_v2  ;;  %v2618_v19 = vsel %vm2615_vm12, %v2606_v60, %v2608_v6  ;;  %v4811_v60 = vld [vmem:[%s5540_s4 + $0x10] sm:$0xf] }
 0x245   :  { %4776 = vmatprep.subr.msk.mxu1 %vm2375_vm10, %v2368_v8 }
 0x246   :  { %4777 = vmatpush1.msk.msra.mxu1 %vm2375_vm10, %v2367_v7 }
 0x247   :  { %4778 = vmatmul.mubr.msk.f32.vlgmr.msra.gmra.mrb[2].mxu1 %vm2371_vm11, %v4772_v3  ;;  %v2866_v9 = vpop.permute.xlu0 %2865  ;;  %v2361_v10 = vpop.permute.xlu1 %2360 }
 0x248   :  { %v2369_v11 = vsel %vm2364_vm9, %v2359_v62, %v2361_v10  ;;  %v2370_v12 = vsel %vm2364_vm9, %v2361_v10, %v2363_v0  ;;  %2594 = vmatprep.mubr.f32.mxu1 %v4979_v2 }
 0x249   :  { %4779 = vmatprep.subr.msk.mxu1 %vm2375_vm10, %v2370_v12 }
 0x24a   :  { %4780 = vmatpush1.msk.msra.mxu1 %vm2375_vm10, %v2369_v11 }
 0x24b   :  { %v2612_v15 = vpop.permute.xlu0 %2611  ;;  %4781 = vmatmul.mubr.msk.f32.vlgmr.msra.gmra.mrb[4].mxu1 %vm2371_vm11, %v4772_v3  ;;  %4782 = vmatprep.subr.msk.mxu1 %vm2375_vm10, %v2617_v13  ;;  %v2610_v16 = vpop.permute.xlu1 %2609 }
 0x24c   :  { %v2619_v17 = vsel %vm2615_vm12, %v2608_v6, %v2610_v16  ;;  %4783 = vmatpush1.msk.msra.mxu1 %vm2375_vm10, %v2616_v14  ;;  %2701 = vmatprep.mubr.f32.mxu1 %v4979_v2  ;;  %v2620_v23 = vsel %vm2615_vm12, %v2610_v16, %v2612_v15  ;;  %v4831_v14 = vld [vmem:[%s5540_s4 + $0x18] sm:$0xf] }
 0x24d   :  { %4785 = vmatprep.subr.msk.mxu1 %vm2375_vm10, %v2619_v17 }
 0x24f   :  { %v2864_v20 = vpop.permute.xlu0 %2863  ;;  %4784 = vmatmul.mubr.msk.f32.vlgmr.msra.gmra.mrb[0].mxu1 %vm2371_vm11, %v2336_v18  ;;  %v2614_v21 = vpop.permute.xlu1 %2613 }
 0x250   :  { %4786 = vmatpush1.msk.msra.mxu1 %vm2375_vm10, %v2618_v19  ;;  %v2621_v22 = vsel %vm2615_vm12, %v2612_v15, %v2614_v21  ;;  %2772 = vmatprep.mubr.f32.mxu1 %v4979_v2  ;;  %v2878_v28 = vsel %vm2877_vm13, %v2864_v20, %v2866_v9 }
 0x251   :  { %4788 = vmatprep.subr.msk.mxu1 %vm2375_vm10, %v2621_v22 }
 0x253   :  { %v2872_v25 = vpop.permute.xlu0 %2871  ;;  %4787 = vmatmul.mubr.msk.f32.vlgmr.msra.gmra.mrb[2].mxu1 %vm2371_vm11, %v2336_v18  ;;  %v2868_v26 = vpop.permute.xlu1 %2867 }
 0x254   :  { %4789 = vmatpush1.msk.msra.mxu1 %vm2375_vm10, %v2620_v23  ;;  %v2879_v27 = vsel %vm2877_vm13, %v2866_v9, %v2868_v26  ;;  %2843 = vmatprep.mubr.f32.mxu1 %v4979_v2 }
 0x255   :  { %4792 = vmatprep.subr.msk.mxu1 %vm2375_vm10, %v2879_v27  ;;  %v4841_v27 = vld [vmem:[%s5540_s4 + $0x1c] sm:$0xf] }
 0x257   :  { %v2876_v29 = vpop.permute.xlu0 %2875  ;;  %4790 = vmatmul.mubr.msk.f32.vlgmr.msra.gmra.mrb[4].mxu1 %vm2371_vm11, %v2336_v18  ;;  %v2870_v30 = vpop.permute.xlu1 %2869 }
 0x258   :  { %4793 = vmatpush1.msk.msra.mxu1 %vm2375_vm10, %v2878_v28  ;;  %v2881_v31 = vsel %vm2877_vm13, %v2870_v30, %v2872_v25  ;;  %2963 = vmatprep.mubr.f32.mxu1 %v4979_v2  ;;  %v2880_v33 = vsel %vm2877_vm13, %v2868_v26, %v2870_v30 }
 0x259   :  { %4795 = vmatprep.subr.msk.mxu1 %vm2375_vm10, %v2881_v31 }
 0x25b   :  { %v3136_v34 = vpop.permute.xlu0 %3135  ;;  %4794 = vmatmul.mubr.msk.f32.vlgmr.msra.gmra.mrb[0].mxu1 %vm2371_vm11, %v4791_v32  ;;  %v3134_v36 = vpop.permute.xlu1 %3133 }
 0x25c   :  { %4796 = vmatpush1.msk.msra.mxu1 %vm2375_vm10, %v2880_v33  ;;  %3034 = vmatprep.mubr.f32.mxu1 %v4979_v2  ;;  %v3147_v42 = vsel %vm3145_vm14, %v3134_v36, %v3136_v34 }
 0x25f   :  { %v3138_v37 = vpop.permute.xlu0 %3137  ;;  %4797 = vmatmul.mubr.msk.f32.vlgmr.msra.gmra.mrb[2].mxu1 %vm2371_vm11, %v4791_v32  ;;  %v2874_v38 = vpop.permute.xlu1 %2873 }
 0x260   :  { %v2882_v40 = vsel %vm2877_vm13, %v2872_v25, %v2874_v38  ;;  %v2883_v41 = vsel %vm2877_vm13, %v2874_v38, %v2876_v29  ;;  %3105 = vmatprep.mubr.f32.mxu1 %v4979_v2  ;;  %v3148_v53 = vsel %vm3145_vm14, %v3136_v34, %v3138_v37 }
 0x261   :  { %4798 = vmatprep.subr.msk.mxu1 %vm2375_vm10, %v2883_v41  ;;  %v4851_v41 = vld [vmem:[%s5540_s4 + $0x20] sm:$0xf] }
 0x262   :  { %4799 = vmatpush1.msk.msra.mxu1 %vm2375_vm10, %v2882_v40 }
 0x263   :  { %v3142_v43 = vpop.permute.xlu0 %3141  ;;  %4800 = vmatmul.mubr.msk.f32.vlgmr.msra.gmra.mrb[4].mxu1 %vm2371_vm11, %v4791_v32  ;;  %4802 = vmatprep.subr.msk.mxu1 %vm2375_vm10, %v3147_v42  ;;  %v3132_v44 = vpop.permute.xlu1 %3131 }
 0x264   :  { %v3146_v45 = vsel %vm3145_vm14, %v3132_v44, %v3134_v36  ;;  %3231 = vmatprep.mubr.f32.mxu1 %v4979_v2 }
 0x265   :  { %4803 = vmatpush1.msk.msra.mxu1 %vm2375_vm10, %v3146_v45 }
 0x267   :  { %v3647_v47 = vpop.permute.xlu0 %3646  ;;  %4804 = vmatmul.mubr.msk.f32.vlgmr.msra.gmra.mrb[0].mxu1 %vm2371_vm11, %v4801_v46  ;;  %v3140_v49 = vpop.permute.xlu1 %3139 }
 0x268   :  { %v3149_v50 = vsel %vm3145_vm14, %v3138_v37, %v3140_v49  ;;  %3302 = vmatprep.mubr.f32.mxu1 %v4979_v2  ;;  %v3150_v57 = vsel %vm3145_vm14, %v3140_v49, %v3142_v43 }
 0x269   :  { %4805 = vmatprep.subr.msk.mxu1 %vm2375_vm10, %v3149_v50 }
 0x26a   :  { %4806 = vmatpush1.msk.msra.mxu1 %vm2375_vm10, %v3148_v53 }
 0x26b   :  { %v3645_v54 = vpop.permute.xlu0 %3644  ;;  %4807 = vmatmul.mubr.msk.f32.vlgmr.msra.gmra.mrb[2].mxu1 %vm2371_vm11, %v4801_v46  ;;  %v3144_v55 = vpop.permute.xlu1 %3143 }
 0x26c   :  { %v3151_v56 = vsel %vm3145_vm14, %v3142_v43, %v3144_v55  ;;  %3373 = vmatprep.mubr.f32.mxu1 %v4979_v2 }
 0x26d   :  { %4808 = vmatprep.subr.msk.mxu1 %vm2375_vm10, %v3151_v56 }
 0x26e   :  { %4809 = vmatpush1.msk.msra.mxu1 %vm2375_vm10, %v3150_v57 }
 0x26f   :  { %v3653_v58 = vpop.permute.xlu0 %3652  ;;  %4810 = vmatmul.mubr.msk.f32.vlgmr.msra.gmra.mrb[4].mxu1 %vm2371_vm11, %v4801_v46  ;;  %4812 = vmatprep.subr.msk.mxu1 %vm2375_vm10, %v5284_v48  ;;  %v3649_v59 = vpop.permute.xlu1 %3648 }
 0x270   :  { %4813 = vmatpush1.msk.msra.mxu1 %vm2375_vm10, %v5275_v24  ;;  %3476 = vmatprep.mubr.f32.mxu1 %v4979_v2  ;;  %v3659_v63 = vsel %vm60_vm0, %v3647_v47, %v3649_v59 }
 0x271   :  { %4815 = vmatprep.subr.msk.mxu1 %vm2375_vm10, %v5294_v51 }
 0x273   :  { %v3657_v61 = vpop.permute.xlu0 %3656  ;;  %4814 = vmatmul.mubr.msk.f32.vlgmr.msra.gmra.mrb[0].mxu1 %vm2371_vm11, %v4811_v60  ;;  %v3651_v62 = vpop.permute.xlu1 %3650 }
 0x274   :  { %4816 = vmatpush1.msk.msra.mxu1 %vm2375_vm10, %v5278_v35  ;;  %3547 = vmatprep.mubr.f32.mxu1 %v4979_v2  ;;  %v3658_v35 = vsel %vm60_vm0, %v3645_v54, %v3647_v47  ;;  %v3660_v1 = vsel %vm60_vm0, %v3649_v59, %v3651_v62 }
 0x275   :  { %4818 = vmatprep.subr.msk.mxu1 %vm2375_vm10, %v5303_v52  ;;  %v3661_v52 = vsel %vm60_vm0, %v3651_v62, %v3653_v58 }
 0x277   :  { %v3916_v24 = vpop.permute.xlu0 %3915  ;;  %4817 = vmatmul.mubr.msk.f32.vlgmr.msra.gmra.mrb[2].mxu1 %vm2371_vm11, %v4811_v60  ;;  %v3914_v48 = vpop.permute.xlu1 %3913 }
 0x278   :  { %4819 = vmatpush1.msk.msra.mxu1 %vm2375_vm10, %v5281_v39  ;;  %3618 = vmatprep.mubr.f32.mxu1 %v4979_v2  ;;  %v4821_v39 = vld [vmem:[%s5540_s4 + $0x14] sm:$0xf]  ;;  %v3927_v9 = vsel %vm3925_vm15, %v3914_v48, %v3916_v24 }
 0x279   :  { %4822 = vmatprep.subr.msk.mxu1 %vm2375_vm10, %v3659_v63 }
 0x27b   :  { %v3918_v51 = vpop.permute.xlu0 %3917  ;;  %4820 = vmatmul.mubr.msk.f32.vlgmr.msra.gmra.mrb[4].mxu1 %vm2371_vm11, %v4811_v60  ;;  %v3912_v0 = vpop.permute.xlu1 %3911 }
 0x27c   :  { %4823 = vmatpush1.msk.msra.mxu1 %vm2375_vm10, %v3658_v35  ;;  %3743 = vmatprep.mubr.f32.mxu1 %v4979_v2  ;;  %v3926_v10 = vsel %vm3925_vm15, %v3912_v0, %v3914_v48  ;;  %v3928_v15 = vsel %vm3925_vm15, %v3916_v24, %v3918_v51 }
 0x27d   :  { %4825 = vmatprep.subr.msk.mxu1 %vm2375_vm10, %v3661_v52 }
 0x27f   :  { %v4182_v3 = vpop.permute.xlu0 %4181  ;;  %4824 = vmatmul.mubr.msk.f32.vlgmr.msra.gmra.mrb[0].mxu1 %vm2371_vm11, %v4821_v39  ;;  %v3655_v4 = vpop.permute.xlu1 %3654 }
 0x280   :  { %4826 = vmatpush1.msk.msra.mxu1 %vm2375_vm10, %v3660_v1  ;;  %v3663_v5 = vsel %vm60_vm0, %v3655_v4, %v3657_v61  ;;  %3814 = vmatprep.mubr.f32.mxu1 %v4979_v2  ;;  %v3662_v6 = vsel %vm60_vm0, %v3653_v58, %v3655_v4 }
 0x281   :  { %4828 = vmatprep.subr.msk.mxu1 %vm2375_vm10, %v3663_v5 }
 0x283   :  { %v3922_v7 = vpop.permute.xlu0 %3921  ;;  %4827 = vmatmul.mubr.msk.f32.vlgmr.msra.gmra.mrb[2].mxu1 %vm2371_vm11, %v4821_v39  ;;  %v3920_v8 = vpop.permute.xlu1 %3919 }
 0x284   :  { %4829 = vmatpush1.msk.msra.mxu1 %vm2375_vm10, %v3662_v6  ;;  %3885 = vmatprep.mubr.f32.mxu1 %v4979_v2  ;;  %v3929_v13 = vsel %vm3925_vm15, %v3918_v51, %v3920_v8  ;;  %v3930_v19 = vsel %vm3925_vm15, %v3920_v8, %v3922_v7 }
 0x285   :  { %4832 = vmatprep.subr.msk.mxu1 %vm2375_vm10, %v3927_v9 }
 0x287   :  { %v4180_v11 = vpop.permute.xlu0 %4179  ;;  %4830 = vmatmul.mubr.msk.f32.vlgmr.msra.gmra.mrb[4].mxu1 %vm2371_vm11, %v4821_v39  ;;  %v3924_v12 = vpop.permute.xlu1 %3923 }
 0x288   :  { %4833 = vmatpush1.msk.msra.mxu1 %vm2375_vm10, %v3926_v10  ;;  %4011 = vmatprep.mubr.f32.mxu1 %v4979_v2  ;;  %v3931_v18 = vsel %vm3925_vm15, %v3922_v7, %v3924_v12  ;;  %v4193_v23 = vsel %vm773_vm3, %v4180_v11, %v4182_v3 }
 0x289   :  { %4835 = vmatprep.subr.msk.mxu1 %vm2375_vm10, %v3929_v13 }
 0x28b   :  { %v4188_v16 = vpop.permute.xlu0 %4187  ;;  %4834 = vmatmul.mubr.msk.f32.vlgmr.msra.gmra.mrb[0].mxu1 %vm2371_vm11, %v4831_v14  ;;  %v4184_v17 = vpop.permute.xlu1 %4183 }
 0x28c   :  { %4836 = vmatpush1.msk.msra.mxu1 %vm2375_vm10, %v3928_v15  ;;  %4082 = vmatprep.mubr.f32.mxu1 %v4979_v2  ;;  %v4194_v21 = vsel %vm773_vm3, %v4182_v3, %v4184_v17 }
 0x28d   :  { %4838 = vmatprep.subr.msk.mxu1 %vm2375_vm10, %v3931_v18 }
 0x28f   :  { %4837 = vmatmul.mubr.msk.f32.vlgmr.msra.gmra.mrb[2].mxu1 %vm2371_vm11, %v4831_v14  ;;  %v4186_v20 = vpop.permute.xlu1 %4185  ;;  %v4192_v22 = vpop.permute.xlu0 %4191 }
 0x290   :  { %4839 = vmatpush1.msk.msra.mxu1 %vm2375_vm10, %v3930_v19  ;;  %4153 = vmatprep.mubr.f32.mxu1 %v4979_v2  ;;  %v4196_v26 = vsel %vm773_vm3, %v4186_v20, %v4188_v16  ;;  %v4195_v28 = vsel %vm773_vm3, %v4184_v17, %v4186_v20 }
 0x291   :  { %4842 = vmatprep.subr.msk.mxu1 %vm2375_vm10, %v4194_v21 }
 0x293   :  { %4840 = vmatmul.mubr.msk.f32.vlgmr.msra.gmra.mrb[4].mxu1 %vm2371_vm11, %v4831_v14  ;;  %v4449_v25 = vpop.permute.xlu1 %4448  ;;  %v4451_v29 = vpop.permute.xlu0 %4450 }
 0x294   :  { %4843 = vmatpush1.msk.msra.mxu1 %vm2375_vm10, %v4193_v23  ;;  %4278 = vmatprep.mubr.f32.mxu1 %v4979_v2  ;;  %v4461_v34 = vsel %vm1024_vm4, %v4449_v25, %v4451_v29 }
 0x295   :  { %4845 = vmatprep.subr.msk.mxu1 %vm2375_vm10, %v4196_v26 }
 0x297   :  { %4844 = vmatmul.mubr.msk.f32.vlgmr.msra.gmra.mrb[0].mxu1 %vm2371_vm11, %v4841_v27  ;;  %v4190_v30 = vpop.permute.xlu1 %4189  ;;  %v4453_v36 = vpop.permute.xlu0 %4452 }
 0x298   :  { %4846 = vmatpush1.msk.msra.mxu1 %vm2375_vm10, %v4195_v28  ;;  %v4198_v31 = vsel %vm773_vm3, %v4190_v30, %v4192_v22  ;;  %4349 = vmatprep.mubr.f32.mxu1 %v4979_v2  ;;  %v4197_v32 = vsel %vm773_vm3, %v4188_v16, %v4190_v30  ;;  %v4462_v42 = vsel %vm1024_vm4, %v4451_v29, %v4453_v36 }
 0x299   :  { %4848 = vmatprep.subr.msk.mxu1 %vm2375_vm10, %v4198_v31 }
 0x29b   :  { %4847 = vmatmul.mubr.msk.f32.vlgmr.msra.gmra.mrb[2].mxu1 %vm2371_vm11, %v4841_v27  ;;  %v4447_v33 = vpop.permute.xlu1 %4446  ;;  %v4457_v43 = vpop.permute.xlu0 %4456 }
 0x29c   :  { %4849 = vmatpush1.msk.msra.mxu1 %vm2375_vm10, %v4197_v32  ;;  %4420 = vmatprep.mubr.f32.mxu1 %v4979_v2  ;;  %v4460_v37 = vsel %vm1024_vm4, %v4447_v33, %v4449_v25 }
 0x29d   :  { %4852 = vmatprep.subr.msk.mxu1 %vm2375_vm10, %v4461_v34 }
 0x29f   :  { %4850 = vmatmul.mubr.msk.f32.vlgmr.msra.gmra.mrb[4].mxu1 %vm2371_vm11, %v4841_v27  ;;  %v4455_v38 = vpop.permute.xlu1 %4454 }
 0x2a0   :  { %4853 = vmatpush1.msk.msra.mxu1 %vm2375_vm10, %v4460_v37  ;;  %v4463_v40 = vsel %vm1024_vm4, %v4453_v36, %v4455_v38  ;;  %4545 = vmatprep.mubr.f32.mxu1 %v4979_v2  ;;  %v4464_v46 = vsel %vm1024_vm4, %v4455_v38, %v4457_v43 }
 0x2a1   :  { %4855 = vmatprep.subr.msk.mxu1 %vm2375_vm10, %v4463_v40 }
 0x2a3   :  { %4854 = vmatmul.mubr.msk.f32.vlgmr.msra.gmra.mrb[0].mxu1 %vm2371_vm11, %v4851_v41  ;;  %v4459_v44 = vpop.permute.xlu1 %4458 }
 0x2a4   :  { %4856 = vmatpush1.msk.msra.mxu1 %vm2375_vm10, %v4462_v42  ;;  %v4465_v45 = vsel %vm1024_vm4, %v4457_v43, %v4459_v44  ;;  %4616 = vmatprep.mubr.f32.mxu1 %v4979_v2 }
 0x2a5   :  { %4858 = vmatprep.subr.msk.mxu1 %vm2375_vm10, %v4465_v45 }
 0x2a7   :  { %4857 = vmatmul.mubr.msk.f32.vlgmr.msra.gmra.mrb[2].mxu1 %vm2371_vm11, %v4851_v41 }
 0x2a8   :  { %4859 = vmatpush1.msk.msra.mxu1 %vm2375_vm10, %v4464_v46  ;;  %4687 = vmatprep.mubr.f32.mxu1 %v4979_v2 }
 0x2ab   :  { %4860 = vmatmul.mubr.msk.f32.vlgmr.msra.gmra.mrb[4].mxu1 %vm2371_vm11, %v4851_v41 }
 0x2ac   :  { %v4704_v47 = vpop.permute.xlu0 %4703 }
 0x376   :  { %v4547_v49 = vpop.f32.mrb[0].mxu1 }
 0x377   :  { %v4706_v50 = vadd.f32 %v4704_v47, %v4547_v49  ;;  %v4549_v53 = vpop.f32.mrb[1].mxu1 }
 0x378   :  { %v4707_v54 = vadd.f32 %v4704_v47, %v4549_v53 }
 0x379   :  { %v4712_v55 = vmax.f32 %v4706_v50, 0.0 }
 0x37a   :  { %v4713_v56 = vmax.f32 %v4707_v54, 0.0  ;;  %v4618_v57 = vpop.f32.mrb[2].mxu1 }
 0x37b   :  { %v4708_v58 = vadd.f32 %v4704_v47, %v4618_v57  ;;  %v4620_v59 = vpop.f32.mrb[3].mxu1 }
 0x37c   :  { %v4724_v60 = vcombine.low %v4712_v55, %v4713_v56  ;;  %v4709_v61 = vadd.f32 %v4704_v47, %v4620_v59 }
 0x37d   :  { %v4714_v62 = vmax.f32 %v4708_v58, 0.0 }
 0x37e   :  { %4730 = vst [vmem:[%s5541_s6] sm:$0xff] %v4724_v60  ;;  %v4715_v2 = vmax.f32 %v4709_v61, 0.0  ;;  %v4689_v24 = vpop.f32.mrb[4].mxu1 }
 0x37f   :  { %v4710_v48 = vadd.f32 %v4704_v47, %v4689_v24  ;;  %v4691_v63 = vpop.f32.mrb[5].mxu1 }
 0x380   :  { %v4725_v35 = vcombine.low %v4714_v62, %v4715_v2  ;;  %v4711_v51 = vadd.f32 %v4704_v47, %v4691_v63 }
 0x381   :  { %v4716_v0 = vmax.f32 %v4710_v48, 0.0 }
 0x382   :  { %4731 = vst [vmem:[%s5541_s6 + $0x8] sm:$0xff] %v4725_v35  ;;  %v4717_v52 = vmax.f32 %v4711_v51, 0.0 }
 0x384   :  { %v4726_v39 = vcombine.low %v4716_v0, %v4717_v52 }
 0x386   :  { %4732 = vst [vmem:[%s5541_s6 + $0x10] sm:$0xff] %v4726_v39 }

</bundles_post_ra>
